<compile_context>
chip_gen: v7x
topology: tpu7x:2x2x1
jax: 0.10.0
libtpu: 0.0.40
codegen_flags: <defaults>
</compile_context>

<pallas_src>
import functools

import jax
import jax.numpy as jnp
from jax.experimental import pallas as pl
from jax.experimental.pallas import tpu as pltpu


def _conv_stats_kernel(x_ref, w_ref, b_ref, y_ref, stat_ref, xh_ref, acc_ref,
                       *, add_bias, emit_stats):
    # x_ref    : (Dp, Hp, Cl)   bf16 padded sample; lane axis = Wp*Cin (128-multiple)
    # w_ref    : (9, Cl, WCo)   bf16 block-Toeplitz weight, one (Cl, WCo) slab per (kd, kh)
    # b_ref    : (1, WCo)       f32 conv bias tiled over W (used only when add_bias)
    # y_ref    : (DH, WCo)      bf16 conv output rows (lane-dense)
    # stat_ref : (2, WCo)       f32 per-sample [row-sum ; row-sum-of-squares]
    # xh_ref   : (Dp*H, Cl)     bf16 scratch: per-kh collapsed input slab
    # acc_ref  : (DH, WCo)      f32 scratch accumulator
    Dp, Hp, Cl = x_ref.shape
    D, H = Dp - 2, Hp - 2
    DH, WCo = y_ref.shape

    acc_ref[...] = jnp.zeros_like(acc_ref)
    for kh in range(3):
        # ONE relayout per kh: collapse (Dp, H, Cl) -> (Dp*H, Cl) into scratch.
        xh_ref[...] = x_ref[:, kh:kh + H, :].reshape(Dp * H, Cl)
        for kd in range(3):
            # kd*H is a multiple of 8 (H is 8-aligned here): pure sublane slice,
            # no relayout; kw taps are already folded into the contraction (Cl).
            patch = xh_ref[kd * H:kd * H + DH, :]
            acc_ref[...] += jnp.dot(patch, w_ref[kd * 3 + kh],
                                    preferred_element_type=jnp.float32)

    acc = acc_ref[...]
    if add_bias:                       # with_BN=True: bias cancels exactly -> skipped
        acc = acc + b_ref[...]
    y_ref[...] = acc.astype(y_ref.dtype)

    if emit_stats:
        # Per-sample partial BatchNorm statistics; reduced over N and W outside.
        stat_ref[0:1, :] = jnp.sum(acc, axis=0, keepdims=True)
        stat_ref[1:2, :] = jnp.sum(acc * acc, axis=0, keepdims=True)


def _bn_relu_kernel(y_ref, scale_ref, shift_ref, o_ref):
    # y_ref (bf16) / o_ref (f32): (TR, WCo) lane-dense; scale/shift: (1, WCo).
    y = y_ref[...].astype(jnp.float32)
    o_ref[...] = jnp.maximum(y * scale_ref[...] + shift_ref[...], 0.0).astype(o_ref.dtype)


def _pick_row_tile(rows, cap=2048):
    """Largest 8-multiple divisor of rows that is <= cap (or rows itself)."""
    if rows <= cap:
        return rows
    for cand in range(cap - (cap % 8), 7, -8):
        if rows % cand == 0:
            return cand
    return rows


def cov3x3_bn_forward(x_ncdhw, weight_dhwio, bias, gamma, beta,
                      eps=1e-5, with_bn=True):
    """Forward of Cov3x3_BN. x_ncdhw: (N, Cin, D, H, W) float32.
    weight_dhwio: (3, 3, 3, Cin, Cout). Returns (N, Cout, D, H, W) float32."""
    # TODO(synk): if adjacent layers can consume the channels-last / lane-dense
    # intermediate, drop these two wrapper transposes (full HBM relayout passes).
    x = jnp.transpose(x_ncdhw, (0, 2, 3, 4, 1)).astype(jnp.bfloat16)   # -> NDHWC, bf16
    N, D, H, W, Cin = x.shape
    Cout = weight_dhwio.shape[-1]
    Dp, Hp = D + 2, H + 2
    DH, WCo = D * H, W * Cout

    # Fused padding: pick Wp >= W+2 so Wp*Cin is a multiple of 128 when possible,
    # so a single jnp.pad pass produces the lane-padded layout directly.
    Wp = W + 2
    if 128 % Cin == 0:
        step = 128 // Cin
        Wp = int(pl.cdiv(W + 2, step)) * step
    Cl = int(pl.cdiv(Wp * Cin, 128)) * 128          # == Wp*Cin when the above hit

    xp = jnp.pad(x, ((0, 0), (1, 1), (1, 1), (1, Wp - W - 1), (0, 0)))
    xpl = xp.reshape(N, Dp, Hp, Wp * Cin)
    if Cl > Wp * Cin:                                # awkward-Cin fallback only
        xpl = jnp.pad(xpl, ((0, 0), (0, 0), (0, 0), (0, Cl - Wp * Cin)))

    # Block-Toeplitz weight (exact gather + mask; no matmul):
    #   wbig[kd*3+kh, p*Cin+ci, w*Cout+co] = weight[kd,kh,p-w,ci,co] if 0<=p-w<=2 else 0
    w32 = weight_dhwio.astype(jnp.float32)
    p_minus_w = jnp.arange(Wp)[:, None] - jnp.arange(W)[None, :]       # (Wp, W)
    valid = (p_minus_w >= 0) & (p_minus_w <= 2)
    wg = w32[:, :, jnp.clip(p_minus_w, 0, 2), :, :]                    # (3,3,Wp,W,Cin,Cout)
    wbig = jnp.where(valid[None, None, :, :, None, None], wg, 0.0)
    wbig = jnp.transpose(wbig, (0, 1, 2, 4, 3, 5)).reshape(9, Wp * Cin, WCo)
    if Cl > Wp * Cin:
        wbig = jnp.pad(wbig, ((0, 0), (0, Cl - Wp * Cin), (0, 0)))
    wbig = wbig.astype(jnp.bfloat16)

    b_t = jnp.tile(bias.astype(jnp.float32), W).reshape(1, WCo)

    # TODO(synk): for volumes where the per-sample x block or the (double-buffered)
    # weight slab no longer fit v7x's 64 MiB VMEM, add a depth-chunk grid axis with
    # a 2-row halo (pl.Element / manual DMA), tile WCo, and single-buffer the
    # grid-invariant weight (pipeline_mode=pl.Buffered(1)).
    # TODO(synk): for large W, chunk W so K = (Wc+2)*Cin ~ 256 (128 on v5e) to avoid
    # banded-Toeplitz zero-FLOP inflation and match the MXU contraction depth.
    kernel1 = functools.partial(_conv_stats_kernel,
                                add_bias=not with_bn, emit_stats=with_bn)
    y, stats = pl.pallas_call(
        kernel1,
        out_shape=(jax.ShapeDtypeStruct((N, DH, WCo), jnp.bfloat16),
                   jax.ShapeDtypeStruct((N, 2, WCo), jnp.float32)),
        grid=(N,),
        in_specs=[pl.BlockSpec((None, Dp, Hp, Cl), lambda n: (n, 0, 0, 0)),
                  pl.BlockSpec((9, Cl, WCo), lambda n: (0, 0, 0)),
                  pl.BlockSpec((1, WCo), lambda n: (0, 0))],
        out_specs=(pl.BlockSpec((None, DH, WCo), lambda n: (n, 0, 0)),
                   pl.BlockSpec((None, 2, WCo), lambda n: (n, 0, 0))),
        scratch_shapes=[pltpu.VMEM((Dp * H, Cl), jnp.bfloat16),
                        pltpu.VMEM((DH, WCo), jnp.float32)],
        compiler_params=pltpu.CompilerParams(
            dimension_semantics=("parallel",),           # per-sample partial stats
            vmem_limit_bytes=32 * 1024 * 1024),
    )(xpl, wbig, b_t)

    if with_bn:
        # PyTorch BatchNorm3d training mode: batch mean / biased variance.
        # TODO(synk): use a mean-shifted / two-pass variance if N*D*H*W gets large.
        stats_c = stats.reshape(N, 2, W, Cout).sum(axis=(0, 2))         # (2, Cout)
        count = float(N * D * H * W)
        mean = stats_c[0] / count
        var = jnp.maximum(stats_c[1] / count - mean * mean, 0.0)
        scale = gamma.astype(jnp.float32) / jnp.sqrt(var + eps)
        shift = beta.astype(jnp.float32) - mean * scale
    else:
        scale = jnp.ones((Cout,), jnp.float32)
        shift = jnp.zeros((Cout,), jnp.float32)
    # TODO(synk): running_mean/running_var momentum updates (training-side state,
    # and eval-mode BN) are not modeled; they do not affect this forward output.

    scale_t = jnp.tile(scale, W).reshape(1, WCo)
    shift_t = jnp.tile(shift, W).reshape(1, WCo)

    # Kernel 2: flatten to (N*DH, WCo) (free collapse of contiguous leading dims)
    # and grid over large lane-dense row chunks.  The NCDHW transpose is NOT
    # folded into the out_spec (last dim would drop below 128 -> masked stores).
    rows = N * DH
    tr = _pick_row_tile(rows)
    y2 = y.reshape(rows, WCo)
    out2d = pl.pallas_call(
        _bn_relu_kernel,
        out_shape=jax.ShapeDtypeStruct((rows, WCo), jnp.float32),
        grid=(rows // tr,),
        in_specs=[pl.BlockSpec((tr, WCo), lambda r: (r, 0)),
                  pl.BlockSpec((1, WCo), lambda r: (0, 0)),
                  pl.BlockSpec((1, WCo), lambda r: (0, 0))],
        out_specs=pl.BlockSpec((tr, WCo), lambda r: (r, 0)),
        compiler_params=pltpu.CompilerParams(
            dimension_semantics=("parallel",),
            vmem_limit_bytes=32 * 1024 * 1024),
    )(y2, scale_t, shift_t)

    out = out2d.reshape(N, D, H, W, Cout)
    return jnp.transpose(out, (0, 4, 1, 2, 3))           # -> NCDHW


def _reference(x_ncdhw, weight_dhwio, bias, gamma, beta, eps=1e-5, with_bn=True):
    """Pure-JAX f32 reference (Conv3d + BatchNorm3d(train) + ReLU)."""
    y = jax.lax.conv_general_dilated(
        jnp.transpose(x_ncdhw, (0, 2, 3, 4, 1)), weight_dhwio,
        window_strides=(1, 1, 1), padding=((1, 1), (1, 1), (1, 1)),
        dimension_numbers=("NDHWC", "DHWIO", "NDHWC"),
        precision=jax.lax.Precision.HIGHEST)
    y = y + bias
    if with_bn:
        mean = jnp.mean(y, axis=(0, 1, 2, 3))
        var = jnp.var(y, axis=(0, 1, 2, 3))
        y = (y - mean) / jnp.sqrt(var + eps) * gamma + beta
    y = jnp.maximum(y, 0.0)
    return jnp.transpose(y, (0, 4, 1, 2, 3))


if __name__ == "__main__":
    key = jax.random.PRNGKey(0)
    kx, kw, kb = jax.random.split(key, 3)

    # Small shapes consistent with Conv3d/BatchNorm3d input (N, C, D, H, W).
    N, Cin, Cout, D, H, W = 2, 4, 8, 8, 16, 16

    x = jax.random.normal(kx, (N, Cin, D, H, W), jnp.float32)

    # Deterministic synthetic parameters (shapes from the module's __init__).
    fan_in = Cin * 3 * 3 * 3
    bound = 1.0 / (fan_in ** 0.5)
    weight = jax.random.uniform(kw, (3, 3, 3, Cin, Cout), jnp.float32,
                                -bound, bound)            # DHWIO layout
    bias = jax.random.uniform(kb, (Cout,), jnp.float32, -bound, bound)
    gamma = jnp.ones((Cout,), jnp.float32)                # BN weight at init
    beta = jnp.zeros((Cout,), jnp.float32)                # BN bias at init

    # with_BN=True path
    out = cov3x3_bn_forward(x, weight, bias, gamma, beta, with_bn=True)
    out = jax.block_until_ready(out)
    ref = _reference(x, weight, bias, gamma, beta, with_bn=True)
    err = float(jnp.max(jnp.abs(out - ref)))
    assert out.shape == (N, Cout, D, H, W), out.shape
    # bf16 MXU operands + bf16 intermediate vs. f32 HIGHEST-precision reference.
    assert jnp.allclose(out, ref, atol=5e-2, rtol=5e-2), f"max abs err {err}"

    # with_BN=False path (conv + bias + ReLU)
    out_nb = cov3x3_bn_forward(x, weight, bias, gamma, beta, with_bn=False)
    out_nb = jax.block_until_ready(out_nb)
    ref_nb = _reference(x, weight, bias, gamma, beta, with_bn=False)
    err_nb = float(jnp.max(jnp.abs(out_nb - ref_nb)))
    assert jnp.allclose(out_nb, ref_nb, atol=5e-2, rtol=5e-2), f"max abs err {err_nb}"

    print("KERNEL_OK")
</pallas_src>

<mosaic_0001>
module attributes {stable_mosaic.version = 11 : i64} {
  func.func @_conv_stats_kernel(%arg0: i32, %arg1: memref<1x10x18x128xbf16, #tpu.memory_space<vmem>>, %arg2: memref<9x128x128xbf16, #tpu.memory_space<vmem>>, %arg3: memref<1x128xf32, #tpu.memory_space<vmem>>, %arg4: memref<1x128x128xbf16, #tpu.memory_space<vmem>>, %arg5: memref<1x2x128xf32, #tpu.memory_space<vmem>>, %arg6: memref<160x128xbf16, #tpu.memory_space<vmem>>, %arg7: memref<128x128xf32, #tpu.memory_space<vmem>>) attributes {dimension_semantics = [#tpu.dimension_semantics<parallel>], iteration_bounds = array<i64: 2>, scalar_prefetch = 0 : i64, scratch_operands = 2 : i64, tpu.core_type = #tpu.core_type<tc>, window_params = [{transform_indices = @transform_0, window_bounds = array<i64: 1, 10, 18, 128>}, {pipeline_mode = #tpu.pipeline_mode<synchronous>, transform_indices = @transform_1, window_bounds = array<i64: 9, 128, 128>}, {pipeline_mode = #tpu.pipeline_mode<synchronous>, transform_indices = @transform_2, window_bounds = array<i64: 1, 128>}, {transform_indices = @transform_3, window_bounds = array<i64: 1, 128, 128>}, {transform_indices = @transform_4, window_bounds = array<i64: 1, 2, 128>}]} {
    %cst = arith.constant 0.000000e+00 : f32
    %0 = vector.broadcast %cst : f32 to vector<128x128xf32>
    %c0 = arith.constant 0 : index
    %c0_0 = arith.constant 0 : index
    %1 = vector.load %arg7[%c0, %c0_0] : memref<128x128xf32, #tpu.memory_space<vmem>>, vector<128x128xf32>
    tpu.vector_store %arg7[%c0, %c0_0], %0 {strides = array<i32>} : memref<128x128xf32, #tpu.memory_space<vmem>>, vector<128x128xf32>,
    %c0_1 = arith.constant 0 : index
    %c0_2 = arith.constant 0 : index
    %c0_3 = arith.constant 0 : index
    %c0_4 = arith.constant 0 : index
    %2 = vector.load %arg1[%c0_1, %c0_2, %c0_3, %c0_4] : memref<1x10x18x128xbf16, #tpu.memory_space<vmem>>, vector<1x10x16x128xbf16>
    %3 = vector.shape_cast %2 : vector<1x10x16x128xbf16> to vector<10x16x128xbf16>
    %4 = vector.shape_cast %3 : vector<10x16x128xbf16> to vector<160x128xbf16>
    %c0_5 = arith.constant 0 : index
    %c0_6 = arith.constant 0 : index
    %5 = vector.load %arg6[%c0_5, %c0_6] : memref<160x128xbf16, #tpu.memory_space<vmem>>, vector<160x128xbf16>
    tpu.vector_store %arg6[%c0_5, %c0_6], %4 {strides = array<i32>} : memref<160x128xbf16, #tpu.memory_space<vmem>>, vector<160x128xbf16>,
    %c0_7 = arith.constant 0 : index
    %c0_8 = arith.constant 0 : index
    %6 = vector.load %arg6[%c0_7, %c0_8] : memref<160x128xbf16, #tpu.memory_space<vmem>>, vector<128x128xbf16>
    %c0_9 = arith.constant 0 : index
    %c0_10 = arith.constant 0 : index
    %7 = vector.load %arg7[%c0_9, %c0_10] : memref<128x128xf32, #tpu.memory_space<vmem>>, vector<128x128xf32>
    %c0_11 = arith.constant 0 : index
    %c0_12 = arith.constant 0 : index
    %c0_13 = arith.constant 0 : index
    %8 = vector.load %arg2[%c0_11, %c0_12, %c0_13] : memref<9x128x128xbf16, #tpu.memory_space<vmem>>, vector<1x128x128xbf16>
    %9 = vector.shape_cast %8 : vector<1x128x128xbf16> to vector<128x128xbf16>
    %cst_14 = arith.constant dense<0.000000e+00> : vector<128x128xf32>
    %10 = tpu.matmul %6, %9, %cst_14 {dimension_numbers = #tpu.dot_dimension_numbers<[1], [0], [0], [1], [0, 0, 1, 1], [], []>} : vector<128x128xbf16>, vector<128x128xbf16>, vector<128x128xf32> -> vector<128x128xf32>
    %11 = arith.addf %7, %10 : vector<128x128xf32>
    %c0_15 = arith.constant 0 : index
    %c0_16 = arith.constant 0 : index
    %12 = vector.load %arg7[%c0_15, %c0_16] : memref<128x128xf32, #tpu.memory_space<vmem>>, vector<128x128xf32>
    tpu.vector_store %arg7[%c0_15, %c0_16], %11 {strides = array<i32>} : memref<128x128xf32, #tpu.memory_space<vmem>>, vector<128x128xf32>,
    %c16 = arith.constant 16 : index
    %c0_17 = arith.constant 0 : index
    %13 = vector.load %arg6[%c16, %c0_17] : memref<160x128xbf16, #tpu.memory_space<vmem>>, vector<128x128xbf16>
    %c0_18 = arith.constant 0 : index
    %c0_19 = arith.constant 0 : index
    %14 = vector.load %arg7[%c0_18, %c0_19] : memref<128x128xf32, #tpu.memory_space<vmem>>, vector<128x128xf32>
    %c3 = arith.constant 3 : index
    %c0_20 = arith.constant 0 : index
    %c0_21 = arith.constant 0 : index
    %15 = vector.load %arg2[%c3, %c0_20, %c0_21] : memref<9x128x128xbf16, #tpu.memory_space<vmem>>, vector<1x128x128xbf16>
    %16 = vector.shape_cast %15 : vector<1x128x128xbf16> to vector<128x128xbf16>
    %cst_22 = arith.constant dense<0.000000e+00> : vector<128x128xf32>
    %17 = tpu.matmul %13, %16, %cst_22 {dimension_numbers = #tpu.dot_dimension_numbers<[1], [0], [0], [1], [0, 0, 1, 1], [], []>} : vector<128x128xbf16>, vector<128x128xbf16>, vector<128x128xf32> -> vector<128x128xf32>
    %18 = arith.addf %14, %17 : vector<128x128xf32>
    %c0_23 = arith.constant 0 : index
    %c0_24 = arith.constant 0 : index
    %19 = vector.load %arg7[%c0_23, %c0_24] : memref<128x128xf32, #tpu.memory_space<vmem>>, vector<128x128xf32>
    tpu.vector_store %arg7[%c0_23, %c0_24], %18 {strides = array<i32>} : memref<128x128xf32, #tpu.memory_space<vmem>>, vector<128x128xf32>,
    %c32 = arith.constant 32 : index
    %c0_25 = arith.constant 0 : index
    %20 = vector.load %arg6[%c32, %c0_25] : memref<160x128xbf16, #tpu.memory_space<vmem>>, vector<128x128xbf16>
    %c0_26 = arith.constant 0 : index
    %c0_27 = arith.constant 0 : index
    %21 = vector.load %arg7[%c0_26, %c0_27] : memref<128x128xf32, #tpu.memory_space<vmem>>, vector<128x128xf32>
    %c6 = arith.constant 6 : index
    %c0_28 = arith.constant 0 : index
    %c0_29 = arith.constant 0 : index
    %22 = vector.load %arg2[%c6, %c0_28, %c0_29] : memref<9x128x128xbf16, #tpu.memory_space<vmem>>, vector<1x128x128xbf16>
    %23 = vector.shape_cast %22 : vector<1x128x128xbf16> to vector<128x128xbf16>
    %cst_30 = arith.constant dense<0.000000e+00> : vector<128x128xf32>
    %24 = tpu.matmul %20, %23, %cst_30 {dimension_numbers = #tpu.dot_dimension_numbers<[1], [0], [0], [1], [0, 0, 1, 1], [], []>} : vector<128x128xbf16>, vector<128x128xbf16>, vector<128x128xf32> -> vector<128x128xf32>
    %25 = arith.addf %21, %24 : vector<128x128xf32>
    %c0_31 = arith.constant 0 : index
    %c0_32 = arith.constant 0 : index
    %26 = vector.load %arg7[%c0_31, %c0_32] : memref<128x128xf32, #tpu.memory_space<vmem>>, vector<128x128xf32>
    tpu.vector_store %arg7[%c0_31, %c0_32], %25 {strides = array<i32>} : memref<128x128xf32, #tpu.memory_space<vmem>>, vector<128x128xf32>,
    %c0_33 = arith.constant 0 : index
    %c0_34 = arith.constant 0 : index
    %c1 = arith.constant 1 : index
    %c0_35 = arith.constant 0 : index
    %27 = vector.load %arg1[%c0_33, %c0_34, %c1, %c0_35] : memref<1x10x18x128xbf16, #tpu.memory_space<vmem>>, vector<1x10x16x128xbf16>
    %28 = vector.shape_cast %27 : vector<1x10x16x128xbf16> to vector<10x16x128xbf16>
    %29 = vector.shape_cast %28 : vector<10x16x128xbf16> to vector<160x128xbf16>
    %c0_36 = arith.constant 0 : index
    %c0_37 = arith.constant 0 : index
    %30 = vector.load %arg6[%c0_36, %c0_37] : memref<160x128xbf16, #tpu.memory_space<vmem>>, vector<160x128xbf16>
    tpu.vector_store %arg6[%c0_36, %c0_37], %29 {strides = array<i32>} : memref<160x128xbf16, #tpu.memory_space<vmem>>, vector<160x128xbf16>,
    %c0_38 = arith.constant 0 : index
    %c0_39 = arith.constant 0 : index
    %31 = vector.load %arg6[%c0_38, %c0_39] : memref<160x128xbf16, #tpu.memory_space<vmem>>, vector<128x128xbf16>
    %c0_40 = arith.constant 0 : index
    %c0_41 = arith.constant 0 : index
    %32 = vector.load %arg7[%c0_40, %c0_41] : memref<128x128xf32, #tpu.memory_space<vmem>>, vector<128x128xf32>
    %c1_42 = arith.constant 1 : index
    %c0_43 = arith.constant 0 : index
    %c0_44 = arith.constant 0 : index
    %33 = vector.load %arg2[%c1_42, %c0_43, %c0_44] : memref<9x128x128xbf16, #tpu.memory_space<vmem>>, vector<1x128x128xbf16>
    %34 = vector.shape_cast %33 : vector<1x128x128xbf16> to vector<128x128xbf16>
    %cst_45 = arith.constant dense<0.000000e+00> : vector<128x128xf32>
    %35 = tpu.matmul %31, %34, %cst_45 {dimension_numbers = #tpu.dot_dimension_numbers<[1], [0], [0], [1], [0, 0, 1, 1], [], []>} : vector<128x128xbf16>, vector<128x128xbf16>, vector<128x128xf32> -> vector<128x128xf32>
    %36 = arith.addf %32, %35 : vector<128x128xf32>
    %c0_46 = arith.constant 0 : index
    %c0_47 = arith.constant 0 : index
    %37 = vector.load %arg7[%c0_46, %c0_47] : memref<128x128xf32, #tpu.memory_space<vmem>>, vector<128x128xf32>
    tpu.vector_store %arg7[%c0_46, %c0_47], %36 {strides = array<i32>} : memref<128x128xf32, #tpu.memory_space<vmem>>, vector<128x128xf32>,
    %c16_48 = arith.constant 16 : index
    %c0_49 = arith.constant 0 : index
    %38 = vector.load %arg6[%c16_48, %c0_49] : memref<160x128xbf16, #tpu.memory_space<vmem>>, vector<128x128xbf16>
    %c0_50 = arith.constant 0 : index
    %c0_51 = arith.constant 0 : index
    %39 = vector.load %arg7[%c0_50, %c0_51] : memref<128x128xf32, #tpu.memory_space<vmem>>, vector<128x128xf32>
    %c4 = arith.constant 4 : index
    %c0_52 = arith.constant 0 : index
    %c0_53 = arith.constant 0 : index
    %40 = vector.load %arg2[%c4, %c0_52, %c0_53] : memref<9x128x128xbf16, #tpu.memory_space<vmem>>, vector<1x128x128xbf16>
    %41 = vector.shape_cast %40 : vector<1x128x128xbf16> to vector<128x128xbf16>
    %cst_54 = arith.constant dense<0.000000e+00> : vector<128x128xf32>
    %42 = tpu.matmul %38, %41, %cst_54 {dimension_numbers = #tpu.dot_dimension_numbers<[1], [0], [0], [1], [0, 0, 1, 1], [], []>} : vector<128x128xbf16>, vector<128x128xbf16>, vector<128x128xf32> -> vector<128x128xf32>
    %43 = arith.addf %39, %42 : vector<128x128xf32>
    %c0_55 = arith.constant 0 : index
    %c0_56 = arith.constant 0 : index
    %44 = vector.load %arg7[%c0_55, %c0_56] : memref<128x128xf32, #tpu.memory_space<vmem>>, vector<128x128xf32>
    tpu.vector_store %arg7[%c0_55, %c0_56], %43 {strides = array<i32>} : memref<128x128xf32, #tpu.memory_space<vmem>>, vector<128x128xf32>,
    %c32_57 = arith.constant 32 : index
    %c0_58 = arith.constant 0 : index
    %45 = vector.load %arg6[%c32_57, %c0_58] : memref<160x128xbf16, #tpu.memory_space<vmem>>, vector<128x128xbf16>
    %c0_59 = arith.constant 0 : index
    %c0_60 = arith.constant 0 : index
    %46 = vector.load %arg7[%c0_59, %c0_60] : memref<128x128xf32, #tpu.memory_space<vmem>>, vector<128x128xf32>
    %c7 = arith.constant 7 : index
    %c0_61 = arith.constant 0 : index
    %c0_62 = arith.constant 0 : index
    %47 = vector.load %arg2[%c7, %c0_61, %c0_62] : memref<9x128x128xbf16, #tpu.memory_space<vmem>>, vector<1x128x128xbf16>
    %48 = vector.shape_cast %47 : vector<1x128x128xbf16> to vector<128x128xbf16>
    %cst_63 = arith.constant dense<0.000000e+00> : vector<128x128xf32>
    %49 = tpu.matmul %45, %48, %cst_63 {dimension_numbers = #tpu.dot_dimension_numbers<[1], [0], [0], [1], [0, 0, 1, 1], [], []>} : vector<128x128xbf16>, vector<128x128xbf16>, vector<128x128xf32> -> vector<128x128xf32>
    %50 = arith.addf %46, %49 : vector<128x128xf32>
    %c0_64 = arith.constant 0 : index
    %c0_65 = arith.constant 0 : index
    %51 = vector.load %arg7[%c0_64, %c0_65] : memref<128x128xf32, #tpu.memory_space<vmem>>, vector<128x128xf32>
    tpu.vector_store %arg7[%c0_64, %c0_65], %50 {strides = array<i32>} : memref<128x128xf32, #tpu.memory_space<vmem>>, vector<128x128xf32>,
    %c0_66 = arith.constant 0 : index
    %c0_67 = arith.constant 0 : index
    %c2 = arith.constant 2 : index
    %c0_68 = arith.constant 0 : index
    %52 = vector.load %arg1[%c0_66, %c0_67, %c2, %c0_68] : memref<1x10x18x128xbf16, #tpu.memory_space<vmem>>, vector<1x10x16x128xbf16>
    %53 = vector.shape_cast %52 : vector<1x10x16x128xbf16> to vector<10x16x128xbf16>
    %54 = vector.shape_cast %53 : vector<10x16x128xbf16> to vector<160x128xbf16>
    %c0_69 = arith.constant 0 : index
    %c0_70 = arith.constant 0 : index
    %55 = vector.load %arg6[%c0_69, %c0_70] : memref<160x128xbf16, #tpu.memory_space<vmem>>, vector<160x128xbf16>
    tpu.vector_store %arg6[%c0_69, %c0_70], %54 {strides = array<i32>} : memref<160x128xbf16, #tpu.memory_space<vmem>>, vector<160x128xbf16>,
    %c0_71 = arith.constant 0 : index
    %c0_72 = arith.constant 0 : index
    %56 = vector.load %arg6[%c0_71, %c0_72] : memref<160x128xbf16, #tpu.memory_space<vmem>>, vector<128x128xbf16>
    %c0_73 = arith.constant 0 : index
    %c0_74 = arith.constant 0 : index
    %57 = vector.load %arg7[%c0_73, %c0_74] : memref<128x128xf32, #tpu.memory_space<vmem>>, vector<128x128xf32>
    %c2_75 = arith.constant 2 : index
    %c0_76 = arith.constant 0 : index
    %c0_77 = arith.constant 0 : index
    %58 = vector.load %arg2[%c2_75, %c0_76, %c0_77] : memref<9x128x128xbf16, #tpu.memory_space<vmem>>, vector<1x128x128xbf16>
    %59 = vector.shape_cast %58 : vector<1x128x128xbf16> to vector<128x128xbf16>
    %cst_78 = arith.constant dense<0.000000e+00> : vector<128x128xf32>
    %60 = tpu.matmul %56, %59, %cst_78 {dimension_numbers = #tpu.dot_dimension_numbers<[1], [0], [0], [1], [0, 0, 1, 1], [], []>} : vector<128x128xbf16>, vector<128x128xbf16>, vector<128x128xf32> -> vector<128x128xf32>
    %61 = arith.addf %57, %60 : vector<128x128xf32>
    %c0_79 = arith.constant 0 : index
    %c0_80 = arith.constant 0 : index
    %62 = vector.load %arg7[%c0_79, %c0_80] : memref<128x128xf32, #tpu.memory_space<vmem>>, vector<128x128xf32>
    tpu.vector_store %arg7[%c0_79, %c0_80], %61 {strides = array<i32>} : memref<128x128xf32, #tpu.memory_space<vmem>>, vector<128x128xf32>,
    %c16_81 = arith.constant 16 : index
    %c0_82 = arith.constant 0 : index
    %63 = vector.load %arg6[%c16_81, %c0_82] : memref<160x128xbf16, #tpu.memory_space<vmem>>, vector<128x128xbf16>
    %c0_83 = arith.constant 0 : index
    %c0_84 = arith.constant 0 : index
    %64 = vector.load %arg7[%c0_83, %c0_84] : memref<128x128xf32, #tpu.memory_space<vmem>>, vector<128x128xf32>
    %c5 = arith.constant 5 : index
    %c0_85 = arith.constant 0 : index
    %c0_86 = arith.constant 0 : index
    %65 = vector.load %arg2[%c5, %c0_85, %c0_86] : memref<9x128x128xbf16, #tpu.memory_space<vmem>>, vector<1x128x128xbf16>
    %66 = vector.shape_cast %65 : vector<1x128x128xbf16> to vector<128x128xbf16>
    %cst_87 = arith.constant dense<0.000000e+00> : vector<128x128xf32>
    %67 = tpu.matmul %63, %66, %cst_87 {dimension_numbers = #tpu.dot_dimension_numbers<[1], [0], [0], [1], [0, 0, 1, 1], [], []>} : vector<128x128xbf16>, vector<128x128xbf16>, vector<128x128xf32> -> vector<128x128xf32>
    %68 = arith.addf %64, %67 : vector<128x128xf32>
    %c0_88 = arith.constant 0 : index
    %c0_89 = arith.constant 0 : index
    %69 = vector.load %arg7[%c0_88, %c0_89] : memref<128x128xf32, #tpu.memory_space<vmem>>, vector<128x128xf32>
    tpu.vector_store %arg7[%c0_88, %c0_89], %68 {strides = array<i32>} : memref<128x128xf32, #tpu.memory_space<vmem>>, vector<128x128xf32>,
    %c32_90 = arith.constant 32 : index
    %c0_91 = arith.constant 0 : index
    %70 = vector.load %arg6[%c32_90, %c0_91] : memref<160x128xbf16, #tpu.memory_space<vmem>>, vector<128x128xbf16>
    %c0_92 = arith.constant 0 : index
    %c0_93 = arith.constant 0 : index
    %71 = vector.load %arg7[%c0_92, %c0_93] : memref<128x128xf32, #tpu.memory_space<vmem>>, vector<128x128xf32>
    %c8 = arith.constant 8 : index
    %c0_94 = arith.constant 0 : index
    %c0_95 = arith.constant 0 : index
    %72 = vector.load %arg2[%c8, %c0_94, %c0_95] : memref<9x128x128xbf16, #tpu.memory_space<vmem>>, vector<1x128x128xbf16>
    %73 = vector.shape_cast %72 : vector<1x128x128xbf16> to vector<128x128xbf16>
    %cst_96 = arith.constant dense<0.000000e+00> : vector<128x128xf32>
    %74 = tpu.matmul %70, %73, %cst_96 {dimension_numbers = #tpu.dot_dimension_numbers<[1], [0], [0], [1], [0, 0, 1, 1], [], []>} : vector<128x128xbf16>, vector<128x128xbf16>, vector<128x128xf32> -> vector<128x128xf32>
    %75 = arith.addf %71, %74 : vector<128x128xf32>
    %c0_97 = arith.constant 0 : index
    %c0_98 = arith.constant 0 : index
    %76 = vector.load %arg7[%c0_97, %c0_98] : memref<128x128xf32, #tpu.memory_space<vmem>>, vector<128x128xf32>
    tpu.vector_store %arg7[%c0_97, %c0_98], %75 {strides = array<i32>} : memref<128x128xf32, #tpu.memory_space<vmem>>, vector<128x128xf32>,
    %c0_99 = arith.constant 0 : index
    %c0_100 = arith.constant 0 : index
    %77 = vector.load %arg7[%c0_99, %c0_100] : memref<128x128xf32, #tpu.memory_space<vmem>>, vector<128x128xf32>
    %78 = arith.truncf %77 : vector<128x128xf32> to vector<128x128xbf16>
    %c0_101 = arith.constant 0 : index
    %c0_102 = arith.constant 0 : index
    %c0_103 = arith.constant 0 : index
    %79 = vector.load %arg4[%c0_101, %c0_102, %c0_103] : memref<1x128x128xbf16, #tpu.memory_space<vmem>>, vector<1x128x128xbf16>
    %80 = vector.shape_cast %79 : vector<1x128x128xbf16> to vector<128x128xbf16>
    %81 = vector.shape_cast %78 : vector<128x128xbf16> to vector<1x128x128xbf16>
    tpu.vector_store %arg4[%c0_101, %c0_102, %c0_103], %81 {strides = array<i32>} : memref<1x128x128xbf16, #tpu.memory_space<vmem>>, vector<1x128x128xbf16>,
    %cst_104 = arith.constant dense<0.000000e+00> : vector<128xf32>
    %82 = vector.multi_reduction <add>, %77, %cst_104 [0] : vector<128x128xf32> to vector<128xf32>
    %83 = vector.shape_cast %82 : vector<128xf32> to vector<1x128xf32>
    %c0_105 = arith.constant 0 : index
    %c0_106 = arith.constant 0 : index
    %c0_107 = arith.constant 0 : index
    %84 = vector.load %arg5[%c0_105, %c0_106, %c0_107] : memref<1x2x128xf32, #tpu.memory_space<vmem>>, vector<1x1x128xf32>
    %85 = vector.shape_cast %84 : vector<1x1x128xf32> to vector<1x128xf32>
    %86 = vector.shape_cast %83 : vector<1x128xf32> to vector<1x1x128xf32>
    tpu.vector_store %arg5[%c0_105, %c0_106, %c0_107], %86 {strides = array<i32>} : memref<1x2x128xf32, #tpu.memory_space<vmem>>, vector<1x1x128xf32>,
    %87 = arith.mulf %77, %77 : vector<128x128xf32>
    %cst_108 = arith.constant dense<0.000000e+00> : vector<128xf32>
    %88 = vector.multi_reduction <add>, %87, %cst_108 [0] : vector<128x128xf32> to vector<128xf32>
    %89 = vector.shape_cast %88 : vector<128xf32> to vector<1x128xf32>
    %c0_109 = arith.constant 0 : index
    %c1_110 = arith.constant 1 : index
    %c0_111 = arith.constant 0 : index
    %90 = vector.load %arg5[%c0_109, %c1_110, %c0_111] : memref<1x2x128xf32, #tpu.memory_space<vmem>>, vector<1x1x128xf32>
    %91 = vector.shape_cast %90 : vector<1x1x128xf32> to vector<1x128xf32>
    %92 = vector.shape_cast %89 : vector<1x128xf32> to vector<1x1x128xf32>
    tpu.vector_store %arg5[%c0_109, %c1_110, %c0_111], %92 {strides = array<i32>} : memref<1x2x128xf32, #tpu.memory_space<vmem>>, vector<1x1x128xf32>,
    return
  }
  func.func @transform_0(%arg0: i32) -> (i32, i32, i32, i32) {
    %c0_i32 = arith.constant 0 : i32
    %c0_i32_0 = arith.constant 0 : i32
    %c0_i32_1 = arith.constant 0 : i32
    %c0_i32_2 = arith.constant 0 : i32
    return %arg0, %c0_i32, %c0_i32_0, %c0_i32_1 : i32, i32, i32, i32
  }
  func.func @transform_1(%arg0: i32) -> (i32, i32, i32) {
    %c0_i32 = arith.constant 0 : i32
    %c0_i32_0 = arith.constant 0 : i32
    %c0_i32_1 = arith.constant 0 : i32
    %c0_i32_2 = arith.constant 0 : i32
    return %c0_i32, %c0_i32_0, %c0_i32_1 : i32, i32, i32
  }
  func.func @transform_2(%arg0: i32) -> (i32, i32) {
    %c0_i32 = arith.constant 0 : i32
    %c0_i32_0 = arith.constant 0 : i32
    %c0_i32_1 = arith.constant 0 : i32
    return %c0_i32, %c0_i32_0 : i32, i32
  }
  func.func @transform_3(%arg0: i32) -> (i32, i32, i32) {
    %c0_i32 = arith.constant 0 : i32
    %c0_i32_0 = arith.constant 0 : i32
    %c0_i32_1 = arith.constant 0 : i32
    return %arg0, %c0_i32, %c0_i32_0 : i32, i32, i32
  }
  func.func @transform_4(%arg0: i32) -> (i32, i32, i32) {
    %c0_i32 = arith.constant 0 : i32
    %c0_i32_0 = arith.constant 0 : i32
    %c0_i32_1 = arith.constant 0 : i32
    return %arg0, %c0_i32, %c0_i32_0 : i32, i32, i32
  }
}

</mosaic_0001>

<bundles_post_ra>
// kernel: tpu_custom_call.1
= control target key start
LH: loop header
LB: loop body
LE: loop exit
PB: predicated region body
PF: predicated region fallthrough
CT: control target
= control target key end

     0   :  { %10 = vsyncpa [#allocation5], 0  ;;  %s4711_s0 = inlined_call_operand.vmem [shape: bf16[2,10,18,128], index: 0, kind: input, shape index: {}]   ;;  %s4712_s1 = inlined_call_operand.hbm [shape: bf16[9,128,128], index: 1, kind: input, shape index: {}]   ;;  %s4713_s2 = inlined_call_operand.vmem [shape: f32[1,128], index: 2, kind: input, shape index: {}]   ;;  %s4714_s3 = inlined_call_operand.hbm [shape: bf16[2,128,128], index: 3, kind: output, shape index: {0}]   ;;  %s4715_s4 = inlined_call_operand.hbm [shape: f32[2,2,128], index: 4, kind: output, shape index: {1}]  }
   0x1   :  { %11 = vsyncpa [#allocation6], 0 }
   0x2   :  { %13 = vsyncpa [#allocation6 + $0x1], 0 }
   0x3   :  { %14 = vsyncpa [#allocation9], 0 }
   0x4   :  { %16 = vsyncpa [#allocation9 + $0x1], 0  ;;  %s4176_s15 = smov 0   ;;  %s4178_s16 = smov 0  }
   0x5   :  { %s4180_s17 = smov 0   ;;  %s4182_s18 = smov 0  }
   0x6 LB: > { %s4197_s2 = sadd.s32 4294967295, %s4142_s18   ;;  %s3090_s19 = sadd.s32 4294967294, %s4142_s18   ;;  %s4142_s18 = sphi %s4182_s18, %s4735_s18   ;;  %s4138_s17 = sphi %s4180_s17, %s4734_s17   ;;  %s4134_s16 = sphi %s4178_s16, %s4733_s16   ;;  %s4130_s15 = sphi %s4176_s15, %s4732_s15  }
   0x7   : > { %s4201_s20 = sadd.s32 1, %s4142_s18   ;;  %s97_s21 = sadd.s32 1, %s4138_s17 }
   0x8   : > { %s94_s22 = ssub.s32 %s4142_s18, %s4201_s20  ;;  %p107_p0 = scmp.ne.s32.totalorder %s4138_s17, %s4134_s16 }
   0x9   : > { %p95_p1 = scmp.eq.s32.totalorder %s94_s22, 0  ;;  %p108_p2 = scmp.eq.s32.totalorder %s4197_s2, 1 }
   0xa   : > { %p113_p3 = scmp.ne.s32.totalorder %s4134_s16, %s4130_s15  ;;  %p114_p4 = scmp.eq.s32.totalorder %s3090_s19, 1 }
   0xb   : > { %s4212_s23 = scalar_select %p95_p1, %s4138_s17, %s97_s21  }
   0xc   : > { %p4214_p5 = por %p108_p2, %p107_p0  ;;  %p4218_p6 = por %p114_p4, %p113_p3 }
   0xd   : > { %p3091_p7 = scmp.ge.s32.totalorder %s4142_s18, 1  ;;  %p147_p8 = scmp.lt.s32.totalorder %s4142_s18, 3 }
   0xe   : > { %s4719_s24 = scalar_select %p4214_p5, 1, 0 }
   0xf   : > { %s4720_s25 = scalar_select %p4218_p6, 1, 0 }
  0x10   : > { %p4716_p9 = scmp.eq.s32.totalorder %s4197_s2, 0  ;;  %p4225_p10 = pnand %p3091_p7, %p147_p8 }
  0x11   : > { %s4144_s27 = smov [#allocation4]   ;;  %s4016_s6 = scalar_lea.hbm %s4712_s1, 9216 }
  0x12   : > { %s4721_s26 = scalar_select %p4225_p10, 1, 0 }
  0x13   : > { %s159_s28 = sshll.u32 %s4144_s27, 4  ;;  %p3883_p11 = pneg %p4225_p10  ;;  %s160_s28 = int_to_ptr.vmem [resolvable:$true] %s159_s28 }
  0x14   : > { %p4017_p13 = scmp.ne.s32.totalorder %s4712_s1, %s4016_s6  ;;  %p4023_p3 = scmp.lt.u32.totalorder %s4016_s6, %s4712_s1 }
  0x15   : > { %p4233_p12 = pnand %p4716_p9, %p3883_p11 }
  0x17   : > { %p4018_p0 = pneg %p4233_p12 }
  0x19   : > { %p4019_p1 = pnand %p4018_p0, %p4017_p13 }
  0x1b   : > { %p4020_p2 = pneg %p4019_p1 }
  0x1d   : > { %p4025_p4 = pnand %p4023_p3, %p4020_p2 }
  0x1f   : > { %4028 = shalt.err (!%p4025_p4)
}
  0x20   : > { %s4029_s11 = scalar_lea.vmem %s160_s28, 9216  ;;  %p4037_p9 = scmp.lt.s32.totalorder %s160_s28, %s160_s28 }
  0x21   : > { %p4030_p7 = scmp.ne.s32.totalorder %s160_s28, %s4029_s11  ;;  %p4038_p6 = scmp.lt.s32.totalorder %s4029_s11, %s4029_s11 }
  0x23   : > { %p4032_p8 = pnand %p4030_p7, %p4018_p0  ;;  %p4039_p5 = por %p4038_p6, %p4037_p9 }
  0x25   : > { %p4033_p11 = pneg %p4032_p8 }
  0x27   : > { %p4040_p10 = pnand %p4039_p5, %p4033_p11 }
  0x29   : > { %4043 = shalt.err (!%p4040_p10)
}
  0x2a   : > { %s4145_s12 = smov 64   ;;  %s4146_s13 = smov 4  }
  0x2b   : > { %3886 = dma.hbm_to_vmem [thread:$0]  (!%p4233_p12), %s4712_s1, 9216, %s160_s28, [#allocation5], %s4145_s12, %s4145_s12, %s4146_s13  }
  0x2c   : > { %p4723_p13 = scmp.ne.s32.totalorder %s4721_s26, 0 }
  0x2d   : > { %p4724_p1 = scmp.eq.s32.totalorder (!%p4723_p13), %s4197_s2, 0 }
  0x2e   : > { %186 = sbr.rel (%p4723_p13) target bundleno = 506 (0x1fa), region = 32 }
  0x35   : > { %4117 = dma.done.wait (%p4724_p1), [#allocation5], 9216   ;;  %p4725_p0 = pmov %p4724_p1 }
  0x36   : > { %v3934_v0 = vld [vmem:[#allocation4] sm:$0xff]   ;;  %v3936_v2 = vld [vmem:[#allocation4 + $0x8] sm:$0xff]   ;;  %p217_p5 = scmp.lt.s32.totalorder %s4197_s2, 1  ;;  %v3938_v4 = vld [vmem:[#allocation4 + $0x10] sm:$0xff]   ;;  %vm1012_vm0 = vsmask.f32 3328 }
  0x37   : > { %4119 = vsyncadd (%p4725_p0), [#allocation5], 4294958080  ;;  %v3935_v1 = vld [vmem:[#allocation4 + $0x100] sm:$0xff]   ;;  %3442 = vmatprep.subr.bf16.mxu1 %v3934_v0  ;;  %v3937_v3 = vld [vmem:[#allocation4 + $0x108] sm:$0xff]   ;;  %vm1013_vm1 = vsmask.f32 7440 }
  0x38   : > { %3570 = vmatprep.subr.bf16.mxu0 %v3935_v1  ;;  %3443 = vmatpush3.bf16.msra.mxu1 %v3934_v0  ;;  %v3939_v5 = vld [vmem:[#allocation4 + $0x110] sm:$0xff]   ;;  %s218_s21 = scalar_select %p217_p5, %s4197_s2, 1  ;;  %v3940_v6 = vld [vmem:[#allocation4 + $0x18] sm:$0xff]   ;;  %v3942_v8 = vld [vmem:[#allocation4 + $0x20] sm:$0xff]   ;;  %vm2019_vm3 = vcmask 1042432   ;;  %vm2020_vm4 = vcmask 1046532  }
  0x39   : > { %3571 = vmatpush3.bf16.msra.mxu0 %v3935_v1  ;;  %3444 = vmatprep.subr.bf16.mxu1 %v3936_v2  ;;  %v3941_v7 = vld [vmem:[#allocation4 + $0x118] sm:$0xff]   ;;  %v3943_v9 = vld [vmem:[#allocation4 + $0x120] sm:$0xff]   ;;  %v3944_v10 = vld [vmem:[#allocation4 + $0x28] sm:$0xff]   ;;  %s4565_s29 = sand.u32 1, %s4134_s16   ;;  %s3250_s6 = sshll.u32 %s4197_s2, 10 }
  0x3a   : > { %3572 = vmatprep.subr.bf16.mxu0 %v3937_v3  ;;  %s3874_s22 = smul.u32 120, %s218_s21  ;;  %v3945_v11 = vld [vmem:[#allocation4 + $0x128] sm:$0xff]   ;;  %v3946_v20 = vld [vmem:[#allocation4 + $0x30] sm:$0xff]   ;;  %v3948_v35 = vld [vmem:[#allocation4 + $0x38] sm:$0xff]   ;;  %s3096_s30 = sshll.u32 %s4565_s29, 6 }
  0x3b   : > { %v3947_v26 = vld [vmem:[#allocation4 + $0x130] sm:$0xff]   ;;  %vm4275_vm2 = vmor %vm1012_vm0, %vm1013_vm1  ;;  %v3949_v44 = vld [vmem:[#allocation4 + $0x138] sm:$0xff]   ;;  %s4580_s5 = scalar_lea.vmem [#allocation7], %s3096_s30  ;;  %s4609_s10 = scalar_lea.hbm %s4714_s3, %s3250_s6 }
  0x3c   : > { %3445 = vmatpush3.bf16.msra.mxu1 %v3936_v2  ;;  %s4264_s28 = scalar_lea.vmem %s4711_s0, %s3874_s22  ;;  %v3952_v51 = vld [vmem:[#allocation4 + $0xc0] sm:$0xff]   ;;  %v3954_v1 = vld [vmem:[#allocation4 + $0xc8] sm:$0xff]   ;;  %vm4407_vm5 = vmor %vm2019_vm3, %vm2020_vm4  ;;  %s2971_s7 = sshll.u32 %s4580_s5, 4  ;;  %s4611_s7 = int_to_ptr.vmem [resolvable:$true] %s2971_s7 }
  0x3d   : > { %3573 = vmatpush3.bf16.msra.mxu0 %v3937_v3  ;;  %3446 = vmatprep.subr.bf16.mxu1 %v3938_v4  ;;  %v3950_v12 = vld [vmem:[%s4264_s28] sm:$0xff]   ;;  %v985_v13 = vld [vmem:[%s4264_s28 + $0xc] sm:$0xf]  ;;  %v986_v14 = vld [vmem:[%s4264_s28 + $0x10] sm:$0xf]  ;;  %s2953_s11 = scalar_lea.sflag [#allocation6], %s4565_s29 }
  0x3e   : > { %3574 = vmatprep.subr.bf16.mxu0 %v3939_v5  ;;  %v987_v15 = vld [vmem:[%s4264_s28 + $0x14] sm:$0x1]  ;;  %3458 = vmatprep.mubr.bf16.mxu1 %v3950_v12  ;;  %v1040_v16 = vshrl.u32 %v985_v13, 16  ;;  %v1043_v17 = vshll.u32 %v985_v13, 16  ;;  %v1049_v18 = vshll.u32 %v986_v14, 16  ;;  %v1053_v19 = vshrl.u32 %v986_v14, 16 }
  0x3f   : > { %v1059_v21 = vshll.u32 %v987_v15, 16  ;;  %v988_v28 = vld [vmem:[%s4264_s28 + $0x18] sm:$0xf]  ;;  %v989_v29 = vld [vmem:[%s4264_s28 + $0x1c] sm:$0xf]  ;;  %v4286_v54 = vld [vmem:[%s4264_s28 + $0xc] sm:$0xff]  }
  0x40   : > { %3447 = vmatpush3.bf16.msra.mxu1 %v3938_v4  ;;  %v1042_v22 = vrot.slane %v1040_v16, 4  ;;  %v1045_v23 = vrot.slane %v1043_v17, 5  ;;  %v1051_v24 = vrot.slane %v1049_v18, 5  ;;  %v1055_v25 = vrot.slane %v1053_v19, 4  ;;  %v990_v32 = vld [vmem:[%s4264_s28 + $0x20] sm:$0x1] }
  0x41   : > { %3575 = vmatpush3.bf16.msra.mxu0 %v3939_v5  ;;  %3448 = vmatprep.subr.bf16.mxu1 %v3940_v6  ;;  %v1061_v27 = vrot.slane %v1059_v21, 5  ;;  %v1064_v33 = vshrl.u32 %v988_v28, 16  ;;  %v1067_v34 = vshll.u32 %v988_v28, 16  ;;  %v1073_v37 = vshll.u32 %v989_v29, 16  ;;  %v3953_v56 = vld [vmem:[#allocation4 + $0x1c0] sm:$0xff]   ;;  %v3955_v5 = vld [vmem:[#allocation4 + $0x1c8] sm:$0xff]  }
  0x42   : > { %3576 = vmatprep.subr.bf16.mxu0 %v3941_v7  ;;  %v1046_v30 = vor.u32 %v1045_v23, %v1042_v22  ;;  %v1056_v31 = vor.u32 %v1055_v25, %v1051_v24  ;;  %v1077_v38 = vshrl.u32 %v989_v29, 16  ;;  %v1083_v39 = vshll.u32 %v990_v32, 16  ;;  %v991_v57 = vld [vmem:[%s4264_s28 + $0x24] sm:$0xf]  ;;  %v992_v58 = vld [vmem:[%s4264_s28 + $0x28] sm:$0xf] }
  0x43   : > { %v1066_v42 = vrot.slane %v1064_v33, 4  ;;  %v1069_v43 = vrot.slane %v1067_v34, 5  ;;  %v1075_v45 = vrot.slane %v1073_v37, 5  ;;  %v993_v60 = vld [vmem:[%s4264_s28 + $0x2c] sm:$0x1]  ;;  %v1088_v61 = vshrl.u32 %v991_v57, 16 }
  0x44   : > { %3449 = vmatpush3.bf16.msra.mxu1 %v3940_v6  ;;  %v1047_v40 = vrot.slane %v1046_v30, 4  ;;  %v1057_v41 = vrot.slane %v1056_v31, 4  ;;  %v1079_v46 = vrot.slane %v1077_v38, 4  ;;  %v1085_v53 = vrot.slane %v1083_v39, 5  ;;  %v4297_v6 = vld [vmem:[%s4264_s28 + $0x18] sm:$0xff]   ;;  %v4307_v28 = vld [vmem:[%s4264_s28 + $0x24] sm:$0xff]  }
  0x45   : > { %3577 = vmatpush3.bf16.msra.mxu0 %v3941_v7  ;;  %3450 = vmatprep.subr.bf16.mxu1 %v3942_v8  ;;  %v1070_v49 = vor.u32 %v1069_v43, %v1066_v42  ;;  %v1091_v62 = vshll.u32 %v991_v57, 16  ;;  %v1097_v63 = vshll.u32 %v992_v58, 16  ;;  %v1101_v2 = vshrl.u32 %v992_v58, 16  ;;  %v994_v13 = vld [vmem:[%s4264_s28 + $0x30] sm:$0xf]  ;;  %v3959_v31 = vld [vmem:[#allocation4 + $0x1d0] sm:$0xff]  }
  0x46   : > { %3578 = vmatprep.subr.bf16.mxu0 %v3943_v9  ;;  %v1052_v47 = vsel %vm4275_vm2, %v1047_v40, %v1051_v24  ;;  %v1062_v48 = vsel %vm4275_vm2, %v1057_v41, %v1061_v27  ;;  %v1080_v52 = vor.u32 %v1079_v46, %v1075_v45  ;;  %v1107_v3 = vshll.u32 %v993_v60, 16  ;;  %v995_v15 = vld [vmem:[%s4264_s28 + $0x34] sm:$0xf]  ;;  %v996_v16 = vld [vmem:[%s4264_s28 + $0x38] sm:$0x1]  ;;  %v3958_v24 = vld [vmem:[#allocation4 + $0xd0] sm:$0xff]  }
  0x47   : > { %v4283_v50 = vcombine.low %v1052_v47, %v1062_v48  ;;  %v1071_v55 = vrot.slane %v1070_v49, 4  ;;  %v1090_v7 = vrot.slane %v1088_v61, 4  ;;  %v1112_v17 = vshrl.u32 %v994_v13, 16  ;;  %v3960_v38 = vld [vmem:[#allocation4 + $0xd8] sm:$0xff]   ;;  %v4317_v42 = vld [vmem:[%s4264_s28 + $0x30] sm:$0xff]   ;;  %s4044_s12 = scalar_lea.vmem %s4611_s7, 1024 }
  0x48   : > { %3451 = vmatpush3.bf16.msra.mxu1 %v3942_v8  ;;  %v1081_v59 = vrot.slane %v1080_v52, 4  ;;  %v1093_v8 = vrot.slane %v1091_v62, 5  ;;  %v1109_v12 = vrot.slane %v1107_v3, 5  ;;  %v1115_v18 = vshll.u32 %v994_v13, 16  ;;  %v3961_v41 = vld [vmem:[#allocation4 + $0x1d8] sm:$0xff]   ;;  %v3964_v62 = vld [vmem:[#allocation4 + $0xe0] sm:$0xff]   ;;  %p4045_p6 = scmp.ne.s32.totalorder %s4611_s7, %s4044_s12 }
  0x49   : > { %3579 = vmatpush3.bf16.msra.mxu0 %v3943_v9  ;;  %3452 = vmatprep.subr.bf16.mxu1 %v3944_v10  ;;  %v1076_v0 = vsel %vm4275_vm2, %v1071_v55, %v1075_v45  ;;  %v1099_v9 = vrot.slane %v1097_v63, 5  ;;  %v1125_v21 = vshrl.u32 %v995_v15, 16  ;;  %v1131_v22 = vshll.u32 %v996_v16, 16  ;;  %v997_v43 = vld [vmem:[%s4264_s28 + $0x3c] sm:$0xf]  ;;  %v4008_v36 = vld [vmem:[#allocation4 + $0x200] sm:$0xff]  }
  0x4a   : > { %3580 = vmatprep.subr.bf16.mxu0 %v3945_v11  ;;  %3586 = vmatprep.mubr.bf16.mxu0 %v4283_v50  ;;  %v1086_v4 = vsel %vm4275_vm2, %v1081_v59, %v1085_v53  ;;  %v1094_v14 = vor.u32 %v1093_v8, %v1090_v7  ;;  %v1114_v25 = vrot.slane %v1112_v17, 4  ;;  %v999_v46 = vld [vmem:[%s4264_s28 + $0x44] sm:$0x1]  ;;  %v1136_v47 = vshrl.u32 %v997_v43, 16  ;;  %v3965_v8 = vld [vmem:[#allocation4 + $0x1e0] sm:$0xff]   ;;  %p4730_p9 = scmp.ne.s32.totalorder %s4719_s24, 0 }
  0x4b   : > { %v1127_v30 = vrot.slane %v1125_v21, 4  ;;  %v1133_v37 = vrot.slane %v1131_v22, 5  ;;  %v1139_v48 = vshll.u32 %v997_v43, 16  ;;  %v1155_v53 = vshll.u32 %v999_v46, 16  ;;  %v3967_v21 = vld [vmem:[#allocation4 + $0x1e8] sm:$0xff]   ;;  %s4147_s13 = smov [#allocation7]  }
  0x4c   : > { %3453 = vmatpush3.bf16.msra.mxu1 %v3944_v10  ;;  %v4299_v10 = vcombine.low %v1076_v0, %v1086_v4  ;;  %v1095_v23 = vrot.slane %v1094_v14, 4  ;;  %v1000_v0 = vld [vmem:[%s4264_s28 + $0x48] sm:$0xf]  ;;  %p4046_p10 = pnand %p4045_p6, %p4730_p9  ;;  %s4048_s14 = sshll.u32 %s4147_s13, 4  ;;  %s4049_s14 = int_to_ptr.vmem [resolvable:$false] %s4048_s14 }
  0x4d   : > { %3581 = vmatpush3.bf16.msra.mxu0 %v3945_v11  ;;  %3454 = vmatprep.subr.bf16.mxu1 %v3946_v20  ;;  %v1103_v11 = vrot.slane %v1101_v2, 4  ;;  %v1141_v57 = vrot.slane %v1139_v48, 5  ;;  %v1157_v61 = vrot.slane %v1155_v53, 5  ;;  %v1002_v2 = vld [vmem:[%s4264_s28 + $0x50] sm:$0x1]  ;;  %v1160_v4 = vshrl.u32 %v1000_v0, 16  ;;  %p4051_p2 = scmp.lt.s32.totalorder %s4611_s7, %s4049_s14 }
  0x4e   : > { %3582 = vmatprep.subr.bf16.mxu0 %v3947_v26  ;;  %v1100_v32 = vsel %vm4275_vm2, %v1095_v23, %v1099_v9  ;;  %v1179_v13 = vshll.u32 %v1002_v2, 16  ;;  %p4047_p12 = pneg %p4046_p10  ;;  %s4050_s19 = scalar_lea.vmem %s4049_s14, 2048 }
  0x4f   : > { %v1104_v19 = vor.u32 %v1103_v11, %v1099_v9  ;;  %v4336_v11 = vld [vmem:[%s4264_s28 + $0x3c] sm:$0xff]   ;;  %p4052_p3 = scmp.lt.s32.totalorder %s4050_s19, %s4044_s12 }
  0x50   : > { %3455 = vmatpush3.bf16.msra.mxu1 %v3946_v20  ;;  %v1121_v20 = vshll.u32 %v995_v15, 16  ;;  %v1162_v15 = vrot.slane %v1160_v4, 4 }
  0x51   : > { %3583 = vmatpush3.bf16.msra.mxu0 %v3947_v26  ;;  %3456 = vmatprep.subr.bf16.mxu1 %v3948_v35  ;;  %v1117_v26 = vrot.slane %v1115_v18, 5  ;;  %v1105_v27 = vrot.slane %v1104_v19, 4  ;;  %v3966_v18 = vld [vmem:[#allocation4 + $0xe8] sm:$0xff]   ;;  %p4053_p4 = por %p4052_p3, %p4051_p2 }
  0x52   : > { %3584 = vmatprep.subr.bf16.mxu0 %v3949_v44  ;;  %v1123_v29 = vrot.slane %v1121_v20, 5 }
  0x53   : > { %v1118_v33 = vor.u32 %v1117_v26, %v1114_v25  ;;  %v1110_v34 = vsel %vm4275_vm2, %v1105_v27, %v1109_v12  ;;  %v1181_v26 = vrot.slane %v1179_v13, 5  ;;  %v4346_v27 = vld [vmem:[%s4264_s28 + $0x48] sm:$0xff]   ;;  %p4054_p7 = pnand %p4053_p4, %p4047_p12 }
  0x54   : > { %3457 = vmatpush3.bf16.msra.mxu1 %v3948_v35  ;;  %v1128_v35 = vor.u32 %v1127_v30, %v1123_v29  ;;  %v4314_v39 = vcombine.low %v1100_v32, %v1110_v34  ;;  %v1004_v30 = vld [vmem:[%s4264_s28 + $0x58] sm:$0xf]  ;;  %v1005_v32 = vld [vmem:[%s4264_s28 + $0x5c] sm:$0x1] }
  0x55   : > { %3585 = vmatpush3.bf16.msra.mxu0 %v3949_v44  ;;  %3474 = vmatprep.subr.bf16.mxu1 %v3952_v51  ;;  %v1119_v40 = vrot.slane %v1118_v33, 4  ;;  %v998_v44 = vld [vmem:[%s4264_s28 + $0x40] sm:$0xf] }
  0x56   : > { %3602 = vmatprep.subr.bf16.mxu0 %v3953_v56  ;;  %v1129_v45 = vrot.slane %v1128_v35, 4  ;;  %v1145_v49 = vshll.u32 %v998_v44, 16  ;;  %v1149_v52 = vshrl.u32 %v998_v44, 16  ;;  %v1193_v35 = vshll.u32 %v1004_v30, 16 }
  0x57   : > { %3459 = vmatmul.mubr.bf16.vlgmr.msra.gmra.mrb[0].mxu1 %v4286_v54 }
  0x58   : > { %3587 = vmatmul.mubr.bf16.vlgmr.msra.gmra.mrb[0].mxu0 %v4299_v10  ;;  %3475 = vmatpush3.bf16.msra.mxu1 %v3952_v51  ;;  %v1124_v51 = vsel %vm4275_vm2, %v1119_v40, %v1123_v29  ;;  %v1134_v55 = vsel %vm4275_vm2, %v1129_v45, %v1133_v37  ;;  %v1147_v58 = vrot.slane %v1145_v49, 5  ;;  %v1151_v60 = vrot.slane %v1149_v52, 4  ;;  %v1003_v29 = vld [vmem:[%s4264_s28 + $0x54] sm:$0xf] }
  0x59   : > { %3603 = vmatpush3.bf16.msra.mxu0 %v3953_v56  ;;  %3476 = vmatprep.subr.bf16.mxu1 %v3954_v1  ;;  %v1138_v56 = vrot.slane %v1136_v47, 4  ;;  %v4328_v59 = vcombine.low %v1124_v51, %v1134_v55  ;;  %v1184_v33 = vshrl.u32 %v1003_v29, 16  ;;  %v1187_v34 = vshll.u32 %v1003_v29, 16  ;;  %v3970_v47 = vld [vmem:[#allocation4 + $0xf0] sm:$0xff]  }
  0x5a   : > { %3604 = vmatprep.subr.bf16.mxu0 %v3955_v5  ;;  %3462 = vmatprep.mubr.bf16.mxu1 %v4297_v6  ;;  %v1152_v3 = vor.u32 %v1151_v60, %v1147_v58  ;;  %v1203_v40 = vshll.u32 %v1005_v32, 16  ;;  %v1195_v46 = vrot.slane %v1193_v35, 5  ;;  %v1006_v55 = vld [vmem:[%s4264_s28 + $0x60] sm:$0xf]  ;;  %v1009_v32 = vld [vmem:[%s4264_s28 + $0x6c] sm:$0xf] }
  0x5b   : > { %3590 = vmatprep.mubr.bf16.mxu0 %v4314_v39  ;;  %v1142_v63 = vor.u32 %v1141_v57, %v1138_v56  ;;  %v1186_v44 = vrot.slane %v1184_v33, 4  ;;  %v1189_v45 = vrot.slane %v1187_v34, 5  ;;  %v1007_v56 = vld [vmem:[%s4264_s28 + $0x64] sm:$0xf]  ;;  %v1008_v57 = vld [vmem:[%s4264_s28 + $0x68] sm:$0x1] }
  0x5c   : > { %3477 = vmatpush3.bf16.msra.mxu1 %v3954_v1  ;;  %v1001_v1 = vld [vmem:[%s4264_s28 + $0x4c] sm:$0xf]  ;;  %v1153_v14 = vrot.slane %v1152_v3, 4  ;;  %v1205_v51 = vrot.slane %v1203_v40, 5  ;;  %v1208_v60 = vshrl.u32 %v1006_v55, 16  ;;  %v1227_v2 = vshll.u32 %v1008_v57, 16 }
  0x5d   : > { %3605 = vmatpush3.bf16.msra.mxu0 %v3955_v5  ;;  %3478 = vmatprep.subr.bf16.mxu1 %v3958_v24  ;;  %v1163_v5 = vshll.u32 %v1000_v0, 16  ;;  %v1169_v7 = vshll.u32 %v1001_v1, 16  ;;  %v1143_v9 = vrot.slane %v1142_v63, 4  ;;  %v1173_v12 = vshrl.u32 %v1001_v1, 16  ;;  %v3971_v63 = vld [vmem:[#allocation4 + $0x1f0] sm:$0xff]   ;;  %v3972_v3 = vld [vmem:[#allocation4 + $0xf8] sm:$0xff]  }
  0x5e   : > { %3606 = vmatprep.subr.bf16.mxu0 %v3959_v31  ;;  %v1158_v22 = vsel %vm4275_vm2, %v1153_v14, %v1157_v61  ;;  %v1190_v53 = vor.u32 %v1189_v45, %v1186_v44  ;;  %v1211_v61 = vshll.u32 %v1006_v55, 16  ;;  %v1221_v1 = vshrl.u32 %v1007_v56, 16  ;;  %v3978_v29 = vld [vmem:[#allocation4 + $0x190] sm:$0xff]   ;;  %v1010_v33 = vld [vmem:[%s4264_s28 + $0x70] sm:$0xf]  ;;  %v3984_v44 = vld [vmem:[#allocation4 + $0x1a8] sm:$0xff]  }
  0x5f   : > { %3463 = vmatmul.mubr.bf16.gmra.mrb[4].mxu1 %v4307_v28  ;;  %v1165_v16 = vrot.slane %v1163_v5, 5  ;;  %v1171_v17 = vrot.slane %v1169_v7, 5  ;;  %v1148_v19 = vsel %vm4275_vm2, %v1143_v9, %v1147_v58  ;;  %v1175_v20 = vrot.slane %v1173_v12, 4  ;;  %v3982_v34 = vld [vmem:[#allocation4 + $0x1a0] sm:$0xff]  }
  0x60   : > { %3479 = vmatpush3.bf16.msra.mxu1 %v3958_v24  ;;  %3466 = vmatprep.mubr.bf16.mxu1 %v4317_v42  ;;  %v4342_v24 = vcombine.low %v1148_v19, %v1158_v22  ;;  %v1191_v0 = vrot.slane %v1190_v53, 4  ;;  %v1210_v5 = vrot.slane %v1208_v60, 4  ;;  %v1213_v7 = vrot.slane %v1211_v61, 5  ;;  %v3974_v19 = vld [vmem:[#allocation4 + $0x180] sm:$0xff]   ;;  %v1960_v53 = vld [vmem:[%s4264_s28 + $0x4] sm:$0xf] }
  0x61   : > { %3607 = vmatpush3.bf16.msra.mxu0 %v3959_v31  ;;  %3480 = vmatprep.subr.bf16.mxu1 %v3960_v38  ;;  %v1166_v23 = vor.u32 %v1165_v16, %v1162_v15  ;;  %v1176_v25 = vor.u32 %v1175_v20, %v1171_v17  ;;  %v1223_v12 = vrot.slane %v1221_v1, 4  ;;  %v3973_v15 = vld [vmem:[#allocation4 + $0x1f8] sm:$0xff]   ;;  %v1232_v35 = vshrl.u32 %v1009_v32, 16  ;;  %v3983_v55 = vld [vmem:[#allocation4 + $0xa0] sm:$0xff]   ;;  %v1959_v61 = vld [vmem:[%s4264_s28] sm:$0xe] }
  0x62   : > { %3591 = vmatmul.mubr.bf16.gmra.mrb[4].mxu0 %v4328_v59  ;;  %3608 = vmatprep.subr.bf16.mxu0 %v3961_v41  ;;  %v1196_v9 = vsel %vm4275_vm2, %v1191_v0, %v1195_v46  ;;  %v1214_v14 = vor.u32 %v1213_v7, %v1210_v5  ;;  %v1245_v40 = vshrl.u32 %v1010_v33, 16  ;;  %v1961_v0 = vld [vmem:[%s4264_s28 + $0x8] sm:$0x1]  ;;  %v3985_v1 = vld [vmem:[#allocation4 + $0xa8] sm:$0xff]   ;;  %v3167_v7 = vrot.slane %v1959_v61, 9 }
  0x63   : > { %v1167_v31 = vrot.slane %v1166_v23, 4  ;;  %3594 = vmatprep.mubr.bf16.mxu0 %v4342_v24  ;;  %v1177_v37 = vrot.slane %v1176_v25, 4  ;;  %v3976_v23 = vld [vmem:[#allocation4 + $0x188] sm:$0xff]   ;;  %v1234_v45 = vrot.slane %v1232_v35, 4  ;;  %v3990_v35 = vld [vmem:[#allocation4 + $0xb8] sm:$0xff]  }
  0x64   : > { %3481 = vmatpush3.bf16.msra.mxu1 %v3960_v38  ;;  %v1197_v38 = vshrl.u32 %v1004_v30, 16  ;;  %v1215_v20 = vrot.slane %v1214_v14, 4  ;;  %v3980_v30 = vld [vmem:[#allocation4 + $0x198] sm:$0xff]   ;;  %v4451_v61 = vld [vmem:[%s4264_s28 + $0x44] sm:$0x1] }
  0x65   : > { %3609 = vmatpush3.bf16.msra.mxu0 %v3961_v41  ;;  %3482 = vmatprep.subr.bf16.mxu1 %v3964_v62  ;;  %v4353_v41 = vld [vmem:[%s4264_s28 + $0x54] sm:$0xff]   ;;  %v1172_v43 = vsel %vm4275_vm2, %v1167_v31, %v1171_v17  ;;  %v1182_v48 = vsel %vm4275_vm2, %v1177_v37, %v1181_v26  ;;  %v1235_v37 = vshll.u32 %v1009_v32, 16  ;;  %v1962_v14 = vld [vmem:[%s4264_s28 + $0xc] sm:$0xe] }
  0x66   : > { %3610 = vmatprep.subr.bf16.mxu0 %v3965_v8  ;;  %v1199_v49 = vrot.slane %v1197_v38, 4  ;;  %v4360_v52 = vcombine.low %v1172_v43, %v1182_v48  ;;  %v3977_v31 = vld [vmem:[#allocation4 + $0x88] sm:$0xff]   ;;  %v1241_v38 = vshll.u32 %v1010_v33, 16  ;;  %v3979_v43 = vld [vmem:[#allocation4 + $0x90] sm:$0xff]  }
  0x67   : > { %3467 = vmatmul.mubr.bf16.gmra.mrb[8].mxu1 %v4336_v11  ;;  %v3993_v33 = vld [vmem:[#allocation4 + $0x48] sm:$0xff]  }
  0x68   : > { %3483 = vmatpush3.bf16.msra.mxu1 %v3964_v62  ;;  %3470 = vmatprep.mubr.bf16.mxu1 %v4346_v27  ;;  %v1200_v58 = vor.u32 %v1199_v49, %v1195_v46  ;;  %v1217_v62 = vshll.u32 %v1007_v56, 16  ;;  %v1237_v46 = vrot.slane %v1235_v37, 5  ;;  %v4392_v48 = vrot.slane %v1241_v38, 5  ;;  %v3987_v56 = vld [vmem:[#allocation4 + $0x1b0] sm:$0xff]  }
  0x69   : > { %3611 = vmatpush3.bf16.msra.mxu0 %v3965_v8  ;;  %3484 = vmatprep.subr.bf16.mxu1 %v3966_v18  ;;  %v1247_v49 = vrot.slane %v1245_v40, 4 }
  0x6a   : > { %3612 = vmatprep.subr.bf16.mxu0 %v3967_v21  ;;  %3595 = vmatmul.mubr.bf16.gmra.mrb[8].mxu0 %v4360_v52  ;;  %v1201_v4 = vrot.slane %v1200_v58, 4  ;;  %v1219_v8 = vrot.slane %v1217_v62, 5  ;;  %v1238_v57 = vor.u32 %v1237_v46, %v1234_v45  ;;  %v4402_v62 = vld [vmem:[%s4264_s28 + $0x60] sm:$0xff]   ;;  %v1970_v45 = vld [vmem:[%s4264_s28 + $0x2c] sm:$0x1] }
  0x6b   : > { %v1248_v60 = vor.u32 %v1247_v49, %v4392_v48  ;;  %v1972_v46 = vld [vmem:[%s4264_s28 + $0x34] sm:$0xf] }
  0x6c   : > { %3485 = vmatpush3.bf16.msra.mxu1 %v3966_v18  ;;  %v1206_v13 = vsel %vm4275_vm2, %v1201_v4, %v1205_v51  ;;  %v1224_v17 = vor.u32 %v1223_v12, %v1219_v8  ;;  %v1229_v18 = vrot.slane %v1227_v2, 5  ;;  %v3981_v51 = vld [vmem:[#allocation4 + $0x98] sm:$0xff]   ;;  %v1239_v2 = vrot.slane %v1238_v57, 4 }
  0x6d   : > { %3613 = vmatpush3.bf16.msra.mxu0 %v3967_v21  ;;  %3486 = vmatprep.subr.bf16.mxu1 %v3970_v47  ;;  %v4372_v16 = vcombine.low %v1196_v9, %v1206_v13  ;;  %v3975_v21 = vld [vmem:[#allocation4 + $0x80] sm:$0xff]   ;;  %v3989_v4 = vld [vmem:[#allocation4 + $0x1b8] sm:$0xff]   ;;  %v1249_v5 = vrot.slane %v1248_v60, 4  ;;  %v2027_v13 = vrot.slane %v1961_v0, 5  ;;  %v2052_v57 = vrot.slane %v1972_v46, 5 }
  0x6e   : > { %3614 = vmatprep.subr.bf16.mxu0 %v3971_v63  ;;  %v1225_v22 = vrot.slane %v1224_v17, 4  ;;  %v1964_v17 = vld [vmem:[%s4264_s28 + $0x14] sm:$0x1]  ;;  %v4448_v60 = vld [vmem:[%s4264_s28 + $0x3c] sm:$0xe] }
  0x6f   : > { %3471 = vmatmul.mubr.bf16.gmra.mrb[12].mxu1 %v4353_v41  ;;  %3598 = vmatprep.mubr.bf16.mxu0 %v4372_v16 }
  0x70   : > { %3487 = vmatpush3.bf16.msra.mxu1 %v3970_v47  ;;  %3490 = vmatprep.mubr.bf16.mxu1 %v4286_v54  ;;  %v1220_v54 = vsel %vm4275_vm2, %v1215_v20, %v1219_v8  ;;  %v1230_v25 = vsel %vm4275_vm2, %v1225_v22, %v1229_v18  ;;  %v1011_v47 = vld [vmem:[%s4264_s28 + $0x74] sm:$0x1]  ;;  %v1963_v8 = vld [vmem:[%s4264_s28 + $0x10] sm:$0xf]  ;;  %v1244_v20 = vsel %vm4275_vm2, %v1239_v2, %v4392_v48  ;;  %v3994_v2 = vld [vmem:[#allocation4 + $0x148] sm:$0xff]  }
  0x71   : > { %3615 = vmatpush3.bf16.msra.mxu0 %v3971_v63  ;;  %3488 = vmatprep.subr.bf16.mxu1 %v3972_v3  ;;  %v4379_v26 = vcombine.low %v1220_v54, %v1230_v25  ;;  %v1251_v58 = vshll.u32 %v1011_v47, 16  ;;  %v2024_v63 = vrot.slane %v1960_v53, 5  ;;  %v3991_v18 = vld [vmem:[#allocation4 + $0x40] sm:$0xff]   ;;  %v1965_v25 = vld [vmem:[%s4264_s28 + $0x18] sm:$0xe]  ;;  %v3995_v47 = vld [vmem:[#allocation4 + $0x50] sm:$0xff]  }
  0x72   : > { %3616 = vmatprep.subr.bf16.mxu0 %v3973_v15  ;;  %v3169_v38 = vrot.slane %v1965_v25, 9  ;;  %v3992_v53 = vld [vmem:[#allocation4 + $0x140] sm:$0xff]   ;;  %v982_v25 = vld [vmem:[%s4264_s28] sm:$0xf] }
  0x73   : > { %3599 = vmatmul.mubr.bf16.gmra.mrb[12].mxu0 %v4379_v26  ;;  %v2026_v12 = vrot.slane %v2024_v63, 4  ;;  %v2025_v54 = vsel %vm4407_vm5, %v3167_v7, %v2024_v63 }
  0x74   : > { %3489 = vmatpush3.bf16.msra.mxu1 %v3972_v3  ;;  %3618 = vmatprep.mubr.bf16.mxu0 %v4299_v10  ;;  %v1253_v3 = vrot.slane %v1251_v58, 5  ;;  %v4445_v58 = vld [vmem:[%s4264_s28 + $0x40] sm:$0xf] }
  0x75   : > { %3617 = vmatpush3.bf16.msra.mxu0 %v3973_v15  ;;  %3506 = vmatprep.subr.bf16.mxu1 %v3974_v19  ;;  %v1966_v15 = vld [vmem:[%s4264_s28 + $0x1c] sm:$0xf] }
  0x76   : > { %3634 = vmatprep.subr.bf16.mxu0 %v3975_v21  ;;  %v2038_v22 = vrot.slane %v1966_v15, 5  ;;  %v2062_v15 = vrot.slane %v4451_v61, 5 }
  0x77   : > { %3491 = vmatmul.mubr.bf16.vlgmr.msra.gmra.mrb[0].mxu1 %v4297_v6 }
  0x78   : > { %3507 = vmatpush3.bf16.msra.mxu1 %v3974_v19  ;;  %3494 = vmatprep.mubr.bf16.mxu1 %v4307_v28  ;;  %v2031_v19 = vrot.slane %v1963_v8, 5  ;;  %v2040_v40 = vrot.slane %v2038_v22, 4  ;;  %v2059_v8 = vrot.slane %v4445_v58, 5 }
  0x79   : > { %3508 = vmatprep.subr.bf16.mxu1 %v3976_v23 }
  0x7a   : > { %v2033_v32 = vrot.slane %v2031_v19, 4 }
  0x7b   : > { %3619 = vmatmul.mubr.bf16.vlgmr.msra.gmra.mrb[0].mxu0 %v4314_v39 }
  0x7c   : > { %3509 = vmatpush3.bf16.msra.mxu1 %v3976_v23  ;;  %3635 = vmatpush3.bf16.msra.mxu0 %v3975_v21  ;;  %v1254_v21 = vsel %vm4275_vm2, %v1249_v5, %v1253_v3  ;;  %v2028_v23 = vsel %vm4407_vm5, %v2026_v12, %v2027_v13  ;;  %v3997_v5 = vld [vmem:[#allocation4 + $0x58] sm:$0xff]   ;;  %v2054_v12 = vrot.slane %v2052_v57, 4 }
  0x7d   : > { %3510 = vmatprep.subr.bf16.mxu1 %v3978_v29  ;;  %3622 = vmatprep.mubr.bf16.mxu0 %v4328_v59  ;;  %v3177_v37 = vcombine.low %v2025_v54, %v2028_v23 }
  0x7e   : > { %3636 = vmatprep.subr.bf16.mxu0 %v3977_v31 }
  0x7f   : > { %3495 = vmatmul.mubr.bf16.gmra.mrb[4].mxu1 %v4317_v42 }
  0x80   : > { %3511 = vmatpush3.bf16.msra.mxu1 %v3978_v29  ;;  %3498 = vmatprep.mubr.bf16.mxu1 %v4336_v11  ;;  %v1967_v29 = vld [vmem:[%s4264_s28 + $0x20] sm:$0x1] }
  0x81   : > { %3512 = vmatprep.subr.bf16.mxu1 %v3980_v30  ;;  %3637 = vmatpush3.bf16.msra.mxu0 %v3977_v31  ;;  %v3142_v31 = vcombine.low %v1244_v20, %v1254_v21  ;;  %v1979_v20 = vld [vmem:[%s4264_s28 + $0x50] sm:$0x1] }
  0x82   : > { %3638 = vmatprep.subr.bf16.mxu0 %v3979_v43 }
  0x83   : > { %3623 = vmatmul.mubr.bf16.gmra.mrb[4].mxu0 %v4342_v24 }
  0x84   : > { %3513 = vmatpush3.bf16.msra.mxu1 %v3980_v30  ;;  %3626 = vmatprep.mubr.bf16.mxu0 %v4360_v52  ;;  %v2034_v30 = vrot.slane %v1964_v17, 5  ;;  %v4461_v17 = vld [vmem:[%s4264_s28 + $0x4c] sm:$0xf] }
  0x85   : > { %3514 = vmatprep.subr.bf16.mxu1 %v3982_v34  ;;  %3639 = vmatpush3.bf16.msra.mxu0 %v3979_v43  ;;  %v2041_v43 = vrot.slane %v1967_v29, 5  ;;  %v2066_v54 = vrot.slane %v4461_v17, 5  ;;  %v983_v29 = vld [vmem:[%s4264_s28 + $0x4] sm:$0xf] }
  0x86   : > { %3640 = vmatprep.subr.bf16.mxu0 %v3981_v51 }
  0x87   : > { %3499 = vmatmul.mubr.bf16.gmra.mrb[8].mxu1 %v4346_v27 }
  0x88   : > { %3515 = vmatpush3.bf16.msra.mxu1 %v3982_v34  ;;  %3502 = vmatprep.mubr.bf16.mxu1 %v4353_v41  ;;  %v1969_v34 = vld [vmem:[%s4264_s28 + $0x28] sm:$0xf] }
  0x89   : > { %3516 = vmatprep.subr.bf16.mxu1 %v3984_v44  ;;  %3641 = vmatpush3.bf16.msra.mxu0 %v3981_v51  ;;  %v2045_v48 = vrot.slane %v1969_v34, 5  ;;  %v2035_v51 = vsel %vm4407_vm5, %v2033_v32, %v2034_v30  ;;  %v4001_v30 = vld [vmem:[#allocation4 + $0x68] sm:$0xff]   ;;  %v1016_v32 = vshrl.u32 %v982_v25, 16  ;;  %v1025_v34 = vshll.u32 %v983_v29, 16 }
  0x8a   : > { %3642 = vmatprep.subr.bf16.mxu0 %v3983_v55 }
  0x8b   : > { %3627 = vmatmul.mubr.bf16.gmra.mrb[8].mxu0 %v4372_v16  ;;  %v1027_v46 = vrot.slane %v1025_v34, 5  ;;  %v1988_v34 = vld [vmem:[%s4264_s28 + $0x74] sm:$0x1] }
  0x8c   : > { %3517 = vmatpush3.bf16.msra.mxu1 %v3984_v44  ;;  %3630 = vmatprep.mubr.bf16.mxu0 %v4379_v26  ;;  %v3168_v26 = vrot.slane %v1962_v14, 9  ;;  %v1968_v44 = vld [vmem:[%s4264_s28 + $0x24] sm:$0xe]  ;;  %v3172_v14 = vrot.slane %v4448_v60, 9  ;;  %v4003_v60 = vld [vmem:[%s4264_s28 + $0x6c] sm:$0xff]  }
  0x8d   : > { %3518 = vmatprep.subr.bf16.mxu1 %v3987_v56  ;;  %3643 = vmatpush3.bf16.msra.mxu0 %v3983_v55  ;;  %v2039_v55 = vsel %vm4407_vm5, %v3169_v38, %v2038_v22  ;;  %v3170_v0 = vrot.slane %v1968_v44, 9  ;;  %v1018_v44 = vrot.slane %v1016_v32, 4 }
  0x8e   : > { %3644 = vmatprep.subr.bf16.mxu0 %v3985_v1  ;;  %v2032_v49 = vsel %vm4407_vm5, %v3168_v26, %v2031_v19  ;;  %v1977_v19 = vld [vmem:[%s4264_s28 + $0x48] sm:$0xe]  ;;  %v984_v26 = vld [vmem:[%s4264_s28 + $0x8] sm:$0x1] }
  0x8f   : > { %3503 = vmatmul.mubr.bf16.gmra.mrb[12].mxu1 %v4402_v62  ;;  %v4453_v63 = vcombine.low %v2032_v49, %v2035_v51  ;;  %v2046_v21 = vsel %vm4407_vm5, %v3170_v0, %v2045_v48  ;;  %v1035_v38 = vshll.u32 %v984_v26, 16  ;;  %v1981_v51 = vld [vmem:[%s4264_s28 + $0x58] sm:$0xf]  ;;  %v1987_v26 = vld [vmem:[%s4264_s28 + $0x70] sm:$0xf] }
  0x90   : > { %3519 = vmatpush3.bf16.msra.mxu1 %v3987_v56  ;;  %3522 = vmatprep.mubr.bf16.mxu1 %v4297_v6  ;;  %v3988_v6 = vld [vmem:[#allocation4 + $0xb0] sm:$0xff]   ;;  %v1973_v56 = vld [vmem:[%s4264_s28 + $0x38] sm:$0x1]  ;;  %v2073_v61 = vrot.slane %v1981_v51, 5  ;;  %v2087_v32 = vrot.slane %v1987_v26, 5 }
  0x91   : > { %3520 = vmatprep.subr.bf16.mxu1 %v3989_v4  ;;  %3645 = vmatpush3.bf16.msra.mxu0 %v3985_v1  ;;  %v2048_v1 = vrot.slane %v1970_v45, 5  ;;  %v2055_v13 = vrot.slane %v1973_v56, 5 }
  0x92   : > { %3646 = vmatprep.subr.bf16.mxu0 %v3988_v6  ;;  %v2075_v17 = vrot.slane %v2073_v61, 4 }
  0x93   : > { %3631 = vmatmul.mubr.bf16.gmra.mrb[12].mxu0 %v3142_v31  ;;  %v2056_v23 = vsel %vm4407_vm5, %v2054_v12, %v2055_v13  ;;  %v3173_v31 = vrot.slane %v1977_v19, 9  ;;  %v4006_v12 = vld [vmem:[#allocation4 + $0x78] sm:$0xff]   ;;  %v4002_v19 = vld [vmem:[#allocation4 + $0x168] sm:$0xff]  }
  0x94   : > { %3521 = vmatpush3.bf16.msra.mxu1 %v3989_v4  ;;  %3650 = vmatprep.mubr.bf16.mxu0 %v3177_v37  ;;  %v2047_v4 = vrot.slane %v2045_v48, 4  ;;  %v1029_v37 = vshrl.u32 %v983_v29, 16  ;;  %v2068_v48 = vrot.slane %v2066_v54, 4  ;;  %v1985_v29 = vld [vmem:[%s4264_s28 + $0x68] sm:$0x1] }
  0x95   : > { %3538 = vmatprep.subr.bf16.mxu1 %v3991_v18  ;;  %3647 = vmatpush3.bf16.msra.mxu0 %v3988_v6  ;;  %v3996_v6 = vld [vmem:[#allocation4 + $0x150] sm:$0xff]  }
  0x96   : > { %3648 = vmatprep.subr.bf16.mxu0 %v3990_v35  ;;  %v2049_v22 = vsel %vm4407_vm5, %v2047_v4, %v2048_v1  ;;  %v1031_v49 = vrot.slane %v1029_v37, 4  ;;  %v2067_v1 = vsel %vm4407_vm5, %v3173_v31, %v2066_v54  ;;  %v1980_v4 = vld [vmem:[%s4264_s28 + $0x54] sm:$0xe]  ;;  %v4007_v54 = vld [vmem:[#allocation4 + $0x178] sm:$0xff]   ;;  %v2083_v31 = vrot.slane %v1985_v29, 5 }
  0x97   : > { %3523 = vmatmul.mubr.bf16.vlgmr.msra.gmra.mrb[0].mxu1 %v4307_v28  ;;  %v1971_v28 = vld [vmem:[%s4264_s28 + $0x30] sm:$0xe] }
  0x98   : > { %3539 = vmatpush3.bf16.msra.mxu1 %v3991_v18  ;;  %3526 = vmatprep.mubr.bf16.mxu1 %v4317_v42  ;;  %v2042_v42 = vsel %vm4407_vm5, %v2040_v40, %v2041_v43  ;;  %v3171_v7 = vrot.slane %v1971_v28, 9  ;;  %v3999_v18 = vld [vmem:[#allocation4 + $0x60] sm:$0xff]   ;;  %v3998_v40 = vld [vmem:[#allocation4 + $0x158] sm:$0xff]   ;;  %v2069_v43 = vrot.slane %v1979_v20, 5 }
  0x99   : > { %3540 = vmatprep.subr.bf16.mxu1 %v3993_v33  ;;  %v4455_v3 = vcombine.low %v2039_v55, %v2042_v42  ;;  %3649 = vmatpush3.bf16.msra.mxu0 %v3990_v35  ;;  %v4483_v35 = vcombine.low %v2046_v21, %v2049_v22  ;;  %v1037_v55 = vrot.slane %v1035_v38, 5  ;;  %v4004_v42 = vld [vmem:[#allocation4 + $0x70] sm:$0xff]  }
  0x9a   : > { %3666 = vmatprep.subr.bf16.mxu0 %v3992_v53  ;;  %v4005_v22 = vld [vmem:[#allocation4 + $0x170] sm:$0xff]  }
  0x9c   : > { %3541 = vmatpush3.bf16.msra.mxu1 %v3993_v33  ;;  %3651 = vmatmul.mubr.bf16.vlgmr.msra.gmra.mrb[0].mxu0 %v4453_v63  ;;  %v1019_v33 = vshll.u32 %v982_v25, 16  ;;  %v1983_v25 = vld [vmem:[%s4264_s28 + $0x60] sm:$0xe] }
  0x9d   : > { %3542 = vmatprep.subr.bf16.mxu1 %v3995_v47  ;;  %3667 = vmatpush3.bf16.msra.mxu0 %v3992_v53  ;;  %v1032_v53 = vor.u32 %v1031_v49, %v1027_v46 }
  0x9e   : > { %3654 = vmatprep.mubr.bf16.mxu0 %v4455_v3  ;;  %3668 = vmatprep.subr.bf16.mxu0 %v3994_v2  ;;  %v1021_v45 = vrot.slane %v1019_v33, 5  ;;  %v1986_v33 = vld [vmem:[%s4264_s28 + $0x6c] sm:$0xe] }
  0x9f   : > { %3527 = vmatmul.mubr.bf16.gmra.mrb[4].mxu1 %v4336_v11  ;;  %v2061_v11 = vrot.slane %v2059_v8, 4  ;;  %v1033_v0 = vrot.slane %v1032_v53, 4 }
  0xa0   : > { %3543 = vmatpush3.bf16.msra.mxu1 %v3995_v47  ;;  %3530 = vmatprep.mubr.bf16.mxu1 %v4346_v27  ;;  %v2053_v27 = vsel %vm4407_vm5, %v3171_v7, %v2052_v57  ;;  %v1022_v28 = vor.u32 %v1021_v45, %v1018_v44  ;;  %v4000_v57 = vld [vmem:[#allocation4 + $0x160] sm:$0xff]  }
  0xa1   : > { %3544 = vmatprep.subr.bf16.mxu1 %v3997_v5  ;;  %3669 = vmatpush3.bf16.msra.mxu0 %v3994_v2  ;;  %v4485_v47 = vcombine.low %v2053_v27, %v2056_v23  ;;  %v2070_v2 = vsel %vm4407_vm5, %v2068_v48, %v2069_v43  ;;  %v1038_v7 = vsel %vm4275_vm2, %v1033_v0, %v1037_v55  ;;  %v4010_v27 = vld [vmem:[#allocation4 + $0x210] sm:$0xff]   ;;  %v4011_v23 = vld [vmem:[#allocation4 + $0x218] sm:$0xff]   ;;  %v2090_v43 = vrot.slane %v1988_v34, 5 }
  0xa2   : > { %3670 = vmatprep.subr.bf16.mxu0 %v3996_v6  ;;  %v1023_v56 = vrot.slane %v1022_v28, 4 }
  0xa4   : > { %3545 = vmatpush3.bf16.msra.mxu1 %v3997_v5  ;;  %3655 = vmatmul.mubr.bf16.gmra.mrb[4].mxu0 %v4483_v35  ;;  %v1982_v5 = vld [vmem:[%s4264_s28 + $0x5c] sm:$0x1]  ;;  %v1028_v58 = vsel %vm4275_vm2, %v1023_v56, %v1027_v46 }
  0xa5   : > { %3546 = vmatprep.subr.bf16.mxu1 %v3999_v18  ;;  %3671 = vmatpush3.bf16.msra.mxu0 %v3996_v6  ;;  %v3133_v13 = vcombine.low %v1028_v58, %v1038_v7 }
  0xa6   : > { %3658 = vmatprep.mubr.bf16.mxu0 %v4485_v47  ;;  %3672 = vmatprep.subr.bf16.mxu0 %v3998_v40 }
  0xa7   : > { %3531 = vmatmul.mubr.bf16.gmra.mrb[8].mxu1 %v4353_v41  ;;  %v2060_v41 = vsel %vm4407_vm5, %v3172_v14, %v2059_v8  ;;  %v4511_v14 = vcombine.low %v2067_v1, %v2070_v2 }
  0xa8   : > { %3547 = vmatpush3.bf16.msra.mxu1 %v3999_v18  ;;  %3534 = vmatprep.mubr.bf16.mxu1 %v4402_v62  ;;  %v2063_v62 = vsel %vm4407_vm5, %v2061_v11, %v2062_v15  ;;  %v3174_v15 = vrot.slane %v1980_v4, 9  ;;  %v2076_v18 = vrot.slane %v1982_v5, 5  ;;  %v4009_v11 = vld [vmem:[#allocation4 + $0x208] sm:$0xff]  }
  0xa9   : > { %3548 = vmatprep.subr.bf16.mxu1 %v4001_v30  ;;  %v4509_v8 = vcombine.low %v2060_v41, %v2063_v62  ;;  %3673 = vmatpush3.bf16.msra.mxu0 %v3998_v40  ;;  %v2089_v40 = vrot.slane %v2087_v32, 4 }
  0xaa   : > { %3674 = vmatprep.subr.bf16.mxu0 %v4000_v57  ;;  %v2074_v20 = vsel %vm4407_vm5, %v3174_v15, %v2073_v61  ;;  %v2077_v21 = vsel %vm4407_vm5, %v2075_v17, %v2076_v18 }
  0xab   : > { %v4519_v6 = vcombine.low %v2074_v20, %v2077_v21  ;;  %v2091_v46 = vsel %vm4407_vm5, %v2089_v40, %v2090_v43 }
  0xac   : > { %3549 = vmatpush3.bf16.msra.mxu1 %v4001_v30  ;;  %3659 = vmatmul.mubr.bf16.gmra.mrb[8].mxu0 %v4509_v8  ;;  %v3175_v30 = vrot.slane %v1983_v25, 9 }
  0xad   : > { %3550 = vmatprep.subr.bf16.mxu1 %v4004_v42  ;;  %3675 = vmatpush3.bf16.msra.mxu0 %v4000_v57 }
  0xae   : > { %3662 = vmatprep.mubr.bf16.mxu0 %v4511_v14  ;;  %3676 = vmatprep.subr.bf16.mxu0 %v4002_v19 }
  0xaf   : > { %3535 = vmatmul.mubr.bf16.gmra.mrb[12].mxu1 %v4003_v60 }
  0xb0   : > { %3551 = vmatpush3.bf16.msra.mxu1 %v4004_v42  ;;  %3554 = vmatprep.mubr.bf16.mxu1 %v3133_v13 }
  0xb1   : > { %3552 = vmatprep.subr.bf16.mxu1 %v4006_v12  ;;  %3677 = vmatpush3.bf16.msra.mxu0 %v4002_v19 }
  0xb2   : > { %3678 = vmatprep.subr.bf16.mxu0 %v4005_v22 }
  0xb4   : > { %3553 = vmatpush3.bf16.msra.mxu1 %v4006_v12  ;;  %3663 = vmatmul.mubr.bf16.gmra.mrb[12].mxu0 %v4519_v6 }
  0xb5   : > { %3730 = vmatprep.subr.bf16.mxu1 %v4008_v36  ;;  %3679 = vmatpush3.bf16.msra.mxu0 %v4005_v22 }
  0xb6   : > { %3682 = vmatprep.mubr.bf16.mxu0 %v4453_v63  ;;  %3680 = vmatprep.subr.bf16.mxu0 %v4007_v54 }
  0xb7   : > { %3555 = vmatmul.mubr.bf16.vlgmr.msra.gmra.mrb[0].mxu1 %v4283_v50  ;;  %v4012_v50 = vld [vmem:[#allocation4 + $0x220] sm:$0xff]  }
  0xb8   : > { %3738 = vmatpush3.bf16.msra.mxu1 %v4008_v36  ;;  %3558 = vmatprep.mubr.bf16.mxu1 %v4299_v10  ;;  %v4013_v10 = vld [vmem:[#allocation4 + $0x228] sm:$0xff]  }
  0xb9   : > { %3731 = vmatprep.subr.bf16.mxu1 %v4009_v11  ;;  %3681 = vmatpush3.bf16.msra.mxu0 %v4007_v54 }
  0xba   : > { %3698 = vmatprep.subr.bf16.mxu0 %v4008_v36 }
  0xbc   : > { %3739 = vmatpush3.bf16.msra.mxu1 %v4009_v11  ;;  %3683 = vmatmul.mubr.bf16.vlgmr.msra.gmra.mrb[0].mxu0 %v4455_v3 }
  0xbd   : > { %3732 = vmatprep.subr.bf16.mxu1 %v4010_v27  ;;  %3699 = vmatpush3.bf16.msra.mxu0 %v4008_v36 }
  0xbe   : > { %3686 = vmatprep.mubr.bf16.mxu0 %v4483_v35  ;;  %3700 = vmatprep.subr.bf16.mxu0 %v4009_v11 }
  0xbf   : > { %3559 = vmatmul.mubr.bf16.gmra.mrb[4].mxu1 %v4314_v39  ;;  %v1984_v39 = vld [vmem:[%s4264_s28 + $0x64] sm:$0xf] }
  0xc0   : > { %3740 = vmatpush3.bf16.msra.mxu1 %v4010_v27  ;;  %3562 = vmatprep.mubr.bf16.mxu1 %v4328_v59  ;;  %v4014_v59 = vld [vmem:[#allocation4 + $0x230] sm:$0xff]   ;;  %v2080_v63 = vrot.slane %v1984_v39, 5 }
  0xc1   : > { %3733 = vmatprep.subr.bf16.mxu1 %v4011_v23  ;;  %3701 = vmatpush3.bf16.msra.mxu0 %v4009_v11 }
  0xc2   : > { %3702 = vmatprep.subr.bf16.mxu0 %v4010_v27  ;;  %v2081_v37 = vsel %vm4407_vm5, %v3175_v30, %v2080_v63 }
  0xc4   : > { %3741 = vmatpush3.bf16.msra.mxu1 %v4011_v23  ;;  %3687 = vmatmul.mubr.bf16.gmra.mrb[4].mxu0 %v4485_v47 }
  0xc5   : > { %3734 = vmatprep.subr.bf16.mxu1 %v4012_v50  ;;  %3703 = vmatpush3.bf16.msra.mxu0 %v4010_v27 }
  0xc6   : > { %3690 = vmatprep.mubr.bf16.mxu0 %v4509_v8  ;;  %3704 = vmatprep.subr.bf16.mxu0 %v4011_v23 }
  0xc7   : > { %3563 = vmatmul.mubr.bf16.gmra.mrb[8].mxu1 %v4342_v24  ;;  %v4015_v24 = vld [vmem:[#allocation4 + $0x238] sm:$0xff]  }
  0xc8   : > { %3742 = vmatpush3.bf16.msra.mxu1 %v4012_v50  ;;  %3566 = vmatprep.mubr.bf16.mxu1 %v4360_v52  ;;  %v2082_v52 = vrot.slane %v2080_v63, 4 }
  0xc9   : > { %3735 = vmatprep.subr.bf16.mxu1 %v4013_v10  ;;  %3705 = vmatpush3.bf16.msra.mxu0 %v4011_v23 }
  0xca   : > { %3706 = vmatprep.subr.bf16.mxu0 %v4012_v50  ;;  %v2084_v38 = vsel %vm4407_vm5, %v2082_v52, %v2083_v31 }
  0xcb   : > { %v3185_v44 = vcombine.low %v2081_v37, %v2084_v38 }
  0xcc   : > { %3743 = vmatpush3.bf16.msra.mxu1 %v4013_v10  ;;  %3691 = vmatmul.mubr.bf16.gmra.mrb[8].mxu0 %v4511_v14 }
  0xcd   : > { %3736 = vmatprep.subr.bf16.mxu1 %v4014_v59  ;;  %3707 = vmatpush3.bf16.msra.mxu0 %v4012_v50 }
  0xce   : > { %3694 = vmatprep.mubr.bf16.mxu0 %v4519_v6  ;;  %3708 = vmatprep.subr.bf16.mxu0 %v4013_v10 }
  0xcf   : > { %3567 = vmatmul.mubr.bf16.gmra.mrb[12].mxu1 %v4372_v16  ;;  %v3176_v16 = vrot.slane %v1986_v33, 9 }
  0xd0   : > { %3744 = vmatpush3.bf16.msra.mxu1 %v4014_v59  ;;  %3722 = vmatprep.mubr.bf16.mxu1 %v4511_v14 }
  0xd1   : > { %3737 = vmatprep.subr.bf16.mxu1 %v4015_v24  ;;  %3709 = vmatpush3.bf16.msra.mxu0 %v4013_v10  ;;  %v2088_v45 = vsel %vm4407_vm5, %v3176_v16, %v2087_v32 }
  0xd2   : > { %3710 = vmatprep.subr.bf16.mxu0 %v4014_v59  ;;  %v3186_v48 = vcombine.low %v2088_v45, %v2091_v46 }
  0xd4   : > { %3745 = vmatpush3.bf16.msra.mxu1 %v4015_v24  ;;  %3695 = vmatmul.mubr.bf16.gmra.mrb[12].mxu0 %v3185_v44 }
  0xd5   : > { %3711 = vmatpush3.bf16.msra.mxu0 %v4014_v59  ;;  %3714 = vmatprep.mubr.bf16.mxu0 %v4455_v3 }
  0xd6   : > { %3712 = vmatprep.subr.bf16.mxu0 %v4015_v24 }
  0xd7   : > { %3723 = vmatmul.mubr.bf16.vlgmr.msra.gmra.mrb[16].mxu1 %v4519_v6 }
  0xd8   : > { %3726 = vmatprep.mubr.bf16.mxu1 %v3185_v44 }
  0xd9   : > { %3713 = vmatpush3.bf16.msra.mxu0 %v4015_v24 }
  0xdc   : > { %3715 = vmatmul.mubr.bf16.vlgmr.msra.gmra.mrb[0].mxu0 %v4483_v35 }
  0xdd   : > { %3718 = vmatprep.mubr.bf16.mxu0 %v4485_v47 }
  0xdf   : > { %3727 = vmatmul.mubr.bf16.gmra.mrb[20].mxu1 %v3186_v48 }
  0xe4   : > { %3719 = vmatmul.mubr.bf16.gmra.mrb[4].mxu0 %v4509_v8 }
 0x18a   : > { %v3556_v49 = vpop.f32.mrb[0].mxu1 }
 0x18b   : > { %v1428_v51 = vpop.f32.mrb[1].mxu1 }
 0x18c   : > { %v3557_v28 = vpop.f32.mrb[2].mxu1 }
 0x18d   : > { %v1431_v53 = vpop.f32.mrb[3].mxu1 }
 0x192   : > { %v4556_v9 = vpop.f32.mrb[4].mxu1 }
 0x193   : > { %v4558_v55 = vpop.f32.mrb[5].mxu1 }
 0x194   : > { %v4560_v42 = vpop.f32.mrb[6].mxu1 }
 0x195   : > { %v4562_v3 = vpop.f32.mrb[7].mxu1 }
 0x19a   : > { %v3564_v56 = vpop.f32.mrb[8].mxu1 }
 0x19b   : > { %v1460_v41 = vpop.f32.mrb[9].mxu1 }
 0x19c   : > { %v3565_v35 = vpop.f32.mrb[10].mxu1 }
 0x19d   : > { %v1463_v62 = vpop.f32.mrb[11].mxu1 }
 0x19f   : > { %v3692_v60 = vpop.f32.mrb[8].mxu0 }
 0x1a0   : > { %v3754_v0 = vadd.f32 %v3692_v60, %v3564_v56  ;;  %v2515_v1 = vpop.f32.mrb[9].mxu0 }
 0x1a1   : > { %v3756_v4 = vadd.f32 %v2515_v1, %v1460_v41  ;;  %v3693_v5 = vpop.f32.mrb[10].mxu0 }
 0x1a2   : > { %v3568_v47 = vpop.f32.mrb[12].mxu1  ;;  %v3758_v58 = vadd.f32 %v3693_v5, %v3565_v35  ;;  %v2518_v7 = vpop.f32.mrb[11].mxu0 }
 0x1a3   : > { %v1476_v57 = vpop.f32.mrb[13].mxu1  ;;  %v3760_v8 = vadd.f32 %v2518_v7, %v1463_v62 }
 0x1a4   : > { %v3569_v61 = vpop.f32.mrb[14].mxu1 }
 0x1a5   : > { %v1479_v2 = vpop.f32.mrb[15].mxu1 }
 0x1a7   : > { %v3696_v15 = vpop.f32.mrb[12].mxu0 }
 0x1a8   : > { %v3762_v19 = vadd.f32 %v3696_v15, %v3568_v47  ;;  %v2531_v36 = vpop.f32.mrb[13].mxu0 }
 0x1a9   : > { %v3764_v22 = vadd.f32 %v2531_v36, %v1476_v57  ;;  %v3697_v6 = vpop.f32.mrb[14].mxu0 }
 0x1aa   : > { %v3724_v12 = vpop.f32.mrb[16].mxu1  ;;  %v3766_v54 = vadd.f32 %v3697_v6, %v3569_v61  ;;  %v2534_v27 = vpop.f32.mrb[15].mxu0 }
 0x1ab   : > { %v4567_v13 = vadd.f32 %v3754_v0, %v3724_v12  ;;  %v2733_v14 = vpop.f32.mrb[17].mxu1  ;;  %v3768_v50 = vadd.f32 %v2534_v27, %v1479_v2 }
 0x1ac   : > { %v4570_v17 = vadd.f32 %v3756_v4, %v2733_v14  ;;  %v3725_v18 = vpop.f32.mrb[18].mxu1 }
 0x1ad   : > { %v4572_v20 = vadd.f32 %v3758_v58, %v3725_v18  ;;  %v2736_v21 = vpop.f32.mrb[19].mxu1 }
 0x1ae   : > { %v4574_v11 = vadd.f32 %v3760_v8, %v2736_v21 }
 0x1af   : > { %v3279_v23 = vpack.c.bf16 %v4572_v20, %v4567_v13  ;;  %v3716_v25 = vpop.f32.mrb[0].mxu0 }
 0x1b0   : > { %v3274_v10 = vpack.c.bf16 %v4574_v11, %v4570_v17  ;;  %v3746_v26 = vadd.f32 %v3716_v25, %v3556_v49  ;;  %v2701_v30 = vpop.f32.mrb[1].mxu0 }
 0x1b1   : > { %3295 = vst [vmem:[%s4580_s5 + $0x28] sm:$0xff] %v3279_v23   ;;  %v3747_v32 = vadd.f32 %v2701_v30, %v1428_v51  ;;  %v3717_v33 = vpop.f32.mrb[2].mxu0 }
 0x1b2   : > { %3294 = vst [vmem:[%s4580_s5 + $0x20] sm:$0xff] %v3274_v10   ;;  %v3728_v39 = vpop.f32.mrb[20].mxu1  ;;  %v3748_v37 = vadd.f32 %v3717_v33, %v3557_v28  ;;  %v2704_v38 = vpop.f32.mrb[3].mxu0  ;;  %v2916_v51 = vmul.f32 %v3746_v26, %v3746_v26 }
 0x1b3   : > { %v4584_v59 = vadd.f32 %v3762_v19, %v3728_v39  ;;  %v2749_v63 = vpop.f32.mrb[21].mxu1  ;;  %v3749_v40 = vadd.f32 %v2704_v38, %v1431_v53  ;;  %v2914_v45 = vmul.f32 %v3747_v32, %v3747_v32 }
 0x1b4   : > { %v4586_v29 = vadd.f32 %v3764_v22, %v2749_v63  ;;  %v3729_v24 = vpop.f32.mrb[22].mxu1  ;;  %v3259_v44 = vpack.c.bf16 %v3748_v37, %v3746_v26  ;;  %v2917_v62 = vmul.f32 %v3748_v37, %v3748_v37 }
 0x1b5   : > { %v4588_v52 = vadd.f32 %v3766_v54, %v3729_v24  ;;  %v2752_v31 = vpop.f32.mrb[23].mxu1  ;;  %v3254_v46 = vpack.c.bf16 %v3749_v40, %v3747_v32  ;;  %v2892_v48 = vadd.f32 %v3749_v40, %v3747_v32  ;;  %v2915_v49 = vmul.f32 %v3749_v40, %v3749_v40 }
 0x1b6   : > { %v4590_v34 = vadd.f32 %v3768_v50, %v2752_v31  ;;  %3291 = vst [vmem:[%s4580_s5 + $0x8] sm:$0xff] %v3259_v44  }
 0x1b7   : > { %v3289_v16 = vpack.c.bf16 %v4588_v52, %v4584_v59  ;;  %3255 = vst [vmem:[%s4580_s5] sm:$0xff] %v3254_v46   ;;  %v2893_v28 = vadd.f32 %v3746_v26, %v2892_v48  ;;  %v2930_v56 = vadd.f32 %v2915_v49, %v2914_v45  ;;  %v3720_v41 = vpop.f32.mrb[4].mxu0 }
 0x1b8   : > { %v3284_v43 = vpack.c.bf16 %v4590_v34, %v4586_v29  ;;  %v3750_v53 = vadd.f32 %v3720_v41, %v4556_v9  ;;  %v2717_v35 = vpop.f32.mrb[5].mxu0 }
 0x1b9   : > { %3297 = vst [vmem:[%s4580_s5 + $0x38] sm:$0xff] %v3289_v16   ;;  %v2931_v47 = vadd.f32 %v2930_v56, %v2916_v51  ;;  %v3751_v57 = vadd.f32 %v2717_v35, %v4558_v55  ;;  %v2894_v60 = vadd.f32 %v3748_v37, %v2893_v28  ;;  %v3721_v61 = vpop.f32.mrb[6].mxu0 }
 0x1ba   : > { %3296 = vst [vmem:[%s4580_s5 + $0x30] sm:$0xff] %v3284_v43   ;;  %v3752_v0 = vadd.f32 %v3721_v61, %v4560_v42  ;;  %v2720_v1 = vpop.f32.mrb[7].mxu0  ;;  %v2920_v12 = vmul.f32 %v3750_v53, %v3750_v53 }
 0x1bb   : > { %v2895_v2 = vadd.f32 %v3751_v57, %v2894_v60  ;;  %v2918_v4 = vmul.f32 %v3751_v57, %v3751_v57  ;;  %v2932_v5 = vadd.f32 %v2931_v47, %v2917_v62  ;;  %v3753_v9 = vadd.f32 %v2720_v1, %v4562_v3 }
 0x1bc   : > { %v3269_v58 = vpack.c.bf16 %v3752_v0, %v3750_v53 }
 0x1bd   : > { %v2933_v55 = vadd.f32 %v2932_v5, %v2918_v4  ;;  %v3264_v42 = vpack.c.bf16 %v3753_v9, %v3751_v57  ;;  %v2896_v7 = vadd.f32 %v3753_v9, %v2895_v2  ;;  %v2919_v8 = vmul.f32 %v3753_v9, %v3753_v9 }
 0x1be   : > { %3293 = vst [vmem:[%s4580_s5 + $0x18] sm:$0xff] %v3269_v58  }
 0x1bf   : > { %3292 = vst [vmem:[%s4580_s5 + $0x10] sm:$0xff] %v3264_v42   ;;  %v2897_v3 = vadd.f32 %v3750_v53, %v2896_v7  ;;  %v2934_v14 = vadd.f32 %v2933_v55, %v2919_v8 }
 0x1c0   : > { %4057 = shalt.err (!%p4054_p7)
}
 0x1c1   : > { %s4058_s21 = scalar_lea.hbm %s4609_s10, 1024  ;;  %s4062_s27 = scalar_lea.hbm %s4714_s3, 2048 }
 0x1c2   : > { %p4059_p8 = scmp.ne.s32.totalorder %s4609_s10, %s4058_s21  ;;  %p4063_p1 = scmp.lt.u32.totalorder %s4609_s10, %s4714_s3 }
 0x1c3   : > { %p4064_p0 = scmp.lt.u32.totalorder %s4062_s27, %s4058_s21  ;;  %p4066_p6 = scmp.lt.u32.totalorder %s4058_s21, %s4609_s10 }
 0x1c4   : > { %p4060_p11 = pnand %p4059_p8, %p4730_p9 }
 0x1c5   : > { %p4065_p5 = por %p4064_p0, %p4063_p1 }
 0x1c6   : > { %p4061_p13 = pneg %p4060_p11 }
 0x1c7   : > { %p4067_p10 = por %p4066_p6, %p4065_p5 }
 0x1c9   : > { %p4068_p12 = pnand %p4067_p10, %p4061_p13 }
 0x1cb   : > { %4071 = shalt.err (!%p4068_p12)
}
 0x1cc   : > { %s4148_s5 = smov 64   ;;  %s4149_s6 = smov 4   ;;  %v2921_v15 = vmul.f32 %v3752_v0, %v3752_v0  ;;  %v2898_v18 = vadd.f32 %v3752_v0, %v2897_v3  ;;  %v2935_v19 = vadd.f32 %v2934_v14, %v2920_v12  ;;  %v2922_v36 = vmul.f32 %v4570_v17, %v4570_v17 }
 0x1cd   : > { %3879 = dma.vmem_to_hbm [thread:$0]  (%p4730_p9), %s4611_s7, 1024, %s4609_s10, %s2953_s11, %s4148_s5, %s4148_s5, %s4149_s6   ;;  %v2923_v6 = vmul.f32 %v4574_v11, %v4574_v11  ;;  %v2924_v23 = vmul.f32 %v4567_v13, %v4567_v13  ;;  %v2925_v39 = vmul.f32 %v4572_v20, %v4572_v20  ;;  %v2927_v30 = vmul.f32 %v4590_v34, %v4590_v34 }
 0x1ce   : > { %v2899_v21 = vadd.f32 %v4570_v17, %v2898_v18  ;;  %v2936_v22 = vadd.f32 %v2935_v19, %v2921_v15  ;;  %v2926_v17 = vmul.f32 %v4586_v29, %v4586_v29  ;;  %v2928_v31 = vmul.f32 %v4584_v59, %v4584_v59  ;;  %s3097_s7 = sshll.u32 %s4565_s29, 1  ;;  %s3231_s8 = sshll.u32 %s4197_s2, 5 }
 0x1cf   : > { %v2929_v33 = vmul.f32 %v4588_v52, %v4588_v52  ;;  %s216_s9 = scalar_lea.vmem [#allocation8], %s3097_s7  ;;  %s4668_s13 = scalar_lea.hbm %s4715_s4, %s3231_s8 }
 0x1d0   : > { %v2937_v54 = vadd.f32 %v2936_v22, %v2922_v36  ;;  %v2900_v27 = vadd.f32 %v4574_v11, %v2899_v21  ;;  %s2987_s10 = sshll.u32 %s216_s9, 4  ;;  %s2958_s14 = scalar_lea.sflag [#allocation9], %s4565_s29  ;;  %s4670_s10 = int_to_ptr.vmem [resolvable:$true] %s2987_s10 }
 0x1d1   : > { %s4072_s19 = scalar_lea.vmem %s4670_s10, 32  ;;  %s4150_s2 = smov [#allocation8]  }
 0x1d2   : > { %v2901_v50 = vadd.f32 %v4567_v13, %v2900_v27  ;;  %v2938_v10 = vadd.f32 %v2937_v54, %v2923_v6  ;;  %p4073_p2 = scmp.ne.s32.totalorder %s4670_s10, %s4072_s19  ;;  %s4076_s21 = sshll.u32 %s4150_s2, 4  ;;  %s4077_s21 = int_to_ptr.vmem [resolvable:$false] %s4076_s21 }
 0x1d3   : > { %s4078_s22 = scalar_lea.vmem %s4077_s21, 64  ;;  %p4079_p7 = scmp.lt.s32.totalorder %s4670_s10, %s4077_s21 }
 0x1d4   : > { %v2902_v63 = vadd.f32 %v4572_v20, %v2901_v50  ;;  %v2939_v25 = vadd.f32 %v2938_v10, %v2924_v23  ;;  %p4074_p3 = pnand %p4073_p2, %p4730_p9  ;;  %p4080_p8 = scmp.lt.s32.totalorder %s4078_s22, %s4072_s19 }
 0x1d6   : > { %v2903_v24 = vadd.f32 %v4586_v29, %v2902_v63  ;;  %v2940_v26 = vadd.f32 %v2939_v25, %v2925_v39  ;;  %p4075_p4 = pneg %p4074_p3  ;;  %p4081_p11 = por %p4080_p8, %p4079_p7 }
 0x1d8   : > { %v2904_v11 = vadd.f32 %v4590_v34, %v2903_v24  ;;  %v2941_v13 = vadd.f32 %v2940_v26, %v2926_v17  ;;  %p4082_p13 = pnand %p4081_p11, %p4075_p4 }
 0x1da   : > { %v2905_v32 = vadd.f32 %v4584_v59, %v2904_v11  ;;  %v2942_v20 = vadd.f32 %v2941_v13, %v2927_v30 }
 0x1dc   : > { %v2906_v37 = vadd.f32 %v4588_v52, %v2905_v32  ;;  %v2943_v29 = vadd.f32 %v2942_v20, %v2928_v31 }
 0x1de   : > { %v2907_v38 = vrot.slane %v2906_v37, 4  ;;  %v2944_v16 = vadd.f32 %v2943_v29, %v2929_v33 }
 0x1e0   : > { %v2908_v40 = vadd.f32 %v2907_v38, %v2906_v37  ;;  %v2945_v43 = vrot.slane %v2944_v16, 4 }
 0x1e2   : > { %v2909_v34 = vrot.slane %v2908_v40, 2  ;;  %v2946_v44 = vadd.f32 %v2945_v43, %v2944_v16 }
 0x1e4   : > { %v2910_v45 = vadd.f32 %v2909_v34, %v2908_v40  ;;  %v2947_v46 = vrot.slane %v2946_v44, 2 }
 0x1e6   : > { %v2911_v59 = vrot.slane %v2910_v45, 1  ;;  %v2948_v48 = vadd.f32 %v2947_v46, %v2946_v44 }
 0x1e8   : > { %v2912_v49 = vadd.f32 %v2911_v59, %v2910_v45  ;;  %v2949_v51 = vrot.slane %v2948_v48, 1 }
 0x1ea   : > { %2913 = vst [vmem:[%s216_s9] sm:$0x1] %v2912_v49  ;;  %v2950_v52 = vadd.f32 %v2949_v51, %v2948_v48 }
 0x1ec   : > { %2951 = vst [vmem:[%s216_s9 + $0x1] sm:$0x1] %v2950_v52 }
 0x1ed   : > { %4085 = shalt.err (!%p4082_p13)
}
 0x1ee   : > { %s4086_s29 = scalar_lea.hbm %s4668_s13, 32  ;;  %s4090_s28 = scalar_lea.hbm %s4715_s4, 64 }
 0x1ef   : > { %p4087_p1 = scmp.ne.s32.totalorder %s4668_s13, %s4086_s29  ;;  %p4091_p6 = scmp.lt.u32.totalorder %s4668_s13, %s4715_s4 }
 0x1f0   : > { %p4092_p10 = scmp.lt.u32.totalorder %s4090_s28, %s4086_s29  ;;  %p4094_p2 = scmp.lt.u32.totalorder %s4086_s29, %s4668_s13 }
 0x1f1   : > { %p4088_p0 = pnand %p4087_p1, %p4730_p9 }
 0x1f2   : > { %p4093_p12 = por %p4092_p10, %p4091_p6 }
 0x1f3   : > { %p4089_p5 = pneg %p4088_p0 }
 0x1f4   : > { %p4095_p3 = por %p4094_p2, %p4093_p12 }
 0x1f6   : > { %p4096_p4 = pnand %p4095_p3, %p4089_p5 }
 0x1f8   : > { %4099 = shalt.err (!%p4096_p4)
}
 0x1f9   : > { %3880 = dma.vmem_to_hbm [thread:$0]  (%p4730_p9), %s4670_s10, 32, %s4668_s13, %s2958_s14  }
 0x1fa PF: > { %p3896_p7 = scmp.ge.s32.totalorder %s4142_s18, 2  ;;  %s2999_s6 = sand.u32 1, %s4130_s15  }
 0x1fb   : > { %p4731_p8 = scmp.ne.s32.totalorder %s4720_s25, 0  ;;  %s3000_s7 = scalar_lea.sflag [#allocation6], %s2999_s6 }
 0x1fd   : > { %p3888_p11 = pnand %p3896_p7, %p4731_p8 }
 0x1ff   : > { %4121 = dma.done.wait (!%p3888_p11), %s3000_s7, 1024  }
 0x200   : > { %4123 = vsyncadd (!%p3888_p11), %s3000_s7, 4294966272  ;;  %s3009_s8 = scalar_lea.sflag [#allocation9], %s2999_s6 }
 0x201   : > { %4125 = dma.done.wait (!%p3888_p11), %s3009_s8, 32  }
 0x202   : > { %4127 = vsyncadd (!%p3888_p11), %s3009_s8, 4294967264  ;;  %p19_p9 = scmp.ge.s32.totalorder %s4201_s20, 4   ;;  %s4732_s15 = smov %s4134_s16 }
 0x203   : > { %s4733_s16 = smov %s4138_s17  ;;  %s4734_s17 = smov %s4212_s23 }
 0x204   : > { %s4735_s18 = smov %s4201_s20  ;;  %21 = sbr.rel (!%p19_p9) target bundleno = 6 (0x6), region = 97 }
 0x20b   :  { %3014 = vsyncpa [#allocation5], 1 }
 0x20c   :  { %3016 = vsyncpa [#allocation5 + $0x1], 1 }
 0x20d   :  { %3017 = vsyncpa [#allocation6], 1 }
 0x20e   :  { %3019 = vsyncpa [#allocation6 + $0x1], 1 }
 0x20f   :  { %3020 = vsyncpa [#allocation9], 1 }
 0x210   :  { %3022 = vsyncpa [#allocation9 + $0x1], 1 }

</bundles_post_ra>
